<compile_context>
chip_gen: v5e
topology: v5e:2x2
jax: 0.10.0
libtpu: 0.0.40
codegen_flags: <defaults>
</compile_context>

<pallas_src>
import jax
import jax.numpy as jnp
from jax import lax
from jax.experimental import pallas as pl
from jax.experimental.pallas import tpu as pltpu

EPS = 1e-5


# --------------------------------------------------------------------------
# Fused kernel: one (batch, row-strip) tile end-to-end.
# --------------------------------------------------------------------------
def down_bottleneck_kernel(xc_ref, xt_ref, xb_ref,
                           p1_ref, w1_ref, wid_ref,
                           p2_ref, w2_ref,
                           p3_ref, w3_ref, bout_ref,
                           o_ref):
    th, wdim, xlast = xc_ref.shape            # strip rows, W/2, Cin or 2*Cin
    cin, c4 = w1_ref.shape
    cout = wid_ref.shape[1]
    m = th * wdim                              # output pixels in this strip
    rows = (th + 2) * wdim                     # + top/bottom halo rows
    cdt = w1_ref.dtype                         # MXU input dtype (f32 / bf16)

    i = pl.program_id(1)
    last = pl.num_programs(1) - 1

    xc = xc_ref[...]
    xt = xt_ref[...]
    xb = xb_ref[...]
    if xlast != cin:                           # fallback: odd columns came along
        xc = xc[:, :, :cin]
        xt = xt[:, :cin]
        xb = xb[:, :cin]
    xc2d = xc.reshape(m, cin)

    # ---- identity path: 1x1 stride-2 conv (bias folded into bout) ----------
    yid = jnp.dot(xc2d.astype(cdt), wid_ref[...],
                  preferred_element_type=jnp.float32)

    # ---- block1: BN1 + ReLU + 1x1 stride-2 conv -----------------------------
    # One fused matmul over [top halo; strip; bottom halo] rows (row order is
    # already the 3x3-conv padded-strip order).
    x1 = jnp.concatenate([xt, xc2d, xb], axis=0).astype(jnp.float32)
    s1 = p1_ref[0:1, :]
    h1 = p1_ref[1:2, :]
    z1 = jnp.maximum(x1 * s1 + h1, 0.0)
    y1 = jnp.dot(z1.astype(cdt), w1_ref[...],
                 preferred_element_type=jnp.float32)          # (rows, C4)

    # ---- block2 input: BN2 + ReLU (b1 folded into shift), zero-pad halos ----
    s2 = p2_ref[0:1, :]
    h2 = p2_ref[1:2, :]
    z2 = jnp.maximum(y1 * s2 + h2, 0.0)
    ridx = lax.broadcasted_iota(jnp.int32, (rows, 1), 0)
    keep = jnp.logical_and(jnp.logical_or(ridx >= wdim, i > 0),
                           jnp.logical_or(ridx < rows - wdim, i < last))
    z2 = jnp.where(keep, z2, 0.0)                              # (rows, C4) f32

    # ---- 3x3 conv (pad 1): dx shifts via XLU roll, accumulate over dy -------
    # Flat roll by +/-1 row only "wraps" into the masked edge columns, so a
    # single sublane rotation + edge mask reproduces the W +/- 1 shift.
    wpos = ridx % wdim
    lmask = (wpos > 0).astype(jnp.float32)
    rmask = (wpos < wdim - 1).astype(jnp.float32)
    zl = pltpu.roll(z2, 1, axis=0) * lmask                     # z2[.., w-1]
    zr = pltpu.roll(z2, rows - 1, axis=0) * rmask              # z2[.., w+1]
    zw = jnp.concatenate([zl.astype(cdt), z2.astype(cdt), zr.astype(cdt)],
                         axis=-1)                              # (rows, 3*C4)
    y2 = jnp.dot(zw[0:m], w2_ref[0], preferred_element_type=jnp.float32)
    y2 = y2 + jnp.dot(zw[wdim:wdim + m], w2_ref[1],
                      preferred_element_type=jnp.float32)
    y2 = y2 + jnp.dot(zw[2 * wdim:2 * wdim + m], w2_ref[2],
                      preferred_element_type=jnp.float32)      # (m, C4)

    # ---- block3: BN3 + ReLU + 1x1 conv, residual add, combined bias ---------
    s3 = p3_ref[0:1, :]
    h3 = p3_ref[1:2, :]
    z3 = jnp.maximum(y2 * s3 + h3, 0.0)
    out = jnp.dot(z3.astype(cdt), w3_ref[...],
                  preferred_element_type=jnp.float32) + yid + bout_ref[...]
    o_ref[...] = out.reshape(th, wdim, cout).astype(o_ref.dtype)


# --------------------------------------------------------------------------
# Wrapper
# --------------------------------------------------------------------------
def _fold_bn(g, b, m, v):
    s = (g / jnp.sqrt(v + EPS)).astype(jnp.float32)
    return s, (b - m * s).astype(jnp.float32)


def _auto_th(H2, W2, N, target_rows=256):
    """Smallest divisor of H2 whose strip has >= target_rows rows and M%8==0."""
    divs = [d for d in range(1, H2 + 1) if H2 % d == 0]
    good = [d for d in divs if d * W2 >= target_rows and (d * W2) % 8 == 0]
    th = min(good) if good else H2
    # keep >= 2 grid steps so a 2-TensorCore chip (v7x) can split the grid,
    # but never drop below a 64-row strip just to get a second step.
    if N * (H2 // th) < 2:
        smaller = [d for d in divs if d < th and d * W2 >= 64]
        if smaller:
            th = max(smaller)
    return th


def _snap_th(H2, th):
    """Snap a requested th UP to the next divisor of H2 (never degrades to 1)."""
    th = max(1, min(int(th), H2))
    while H2 % th:
        th += 1
    return th


def down_bottleneck_forward_nhwc(x, params, *, th=None,
                                 compute_dtype=jnp.float32,
                                 vmem_limit_mb=64):
    """x: (N, H, W, Cin) float32. Returns (N, H/2, W/2, Cout) float32."""
    x = x.astype(jnp.float32)
    N, H, W, Cin = x.shape
    # TODO(synk): odd spatial sizes (PyTorch ceil output for stride 2) not handled.
    assert H % 2 == 0 and W % 2 == 0
    H2, W2 = H // 2, W // 2

    C4 = params["w1"].shape[1]
    Cout = params["wid"].shape[1]

    th = _auto_th(H2, W2, N) if th is None else _snap_th(H2, th)
    n_strips = H2 // th

    # Fold BN running stats; fold conv biases into the *next* BN shift so the
    # kernel does one bias add total (b3 + bid) and 4 packed per-channel loads.
    s1, h1 = _fold_bn(params["bn1_g"], params["bn1_b"], params["bn1_m"], params["bn1_v"])
    s2, h2 = _fold_bn(params["bn2_g"], params["bn2_b"], params["bn2_m"], params["bn2_v"])
    s3, h3 = _fold_bn(params["bn3_g"], params["bn3_b"], params["bn3_m"], params["bn3_v"])
    b1 = params["b1"].reshape(-1).astype(jnp.float32)
    b2 = params["b2"].reshape(-1).astype(jnp.float32)
    b3 = params["b3"].reshape(-1).astype(jnp.float32)
    bid = params["bid"].reshape(-1).astype(jnp.float32)
    p1 = jnp.stack([s1, h1])                     # (2, Cin)
    p2 = jnp.stack([s2, h2 + s2 * b1])           # (2, C4)
    p3 = jnp.stack([s3, h3 + s3 * b2])           # (2, C4)
    bout = (b3 + bid).reshape(1, Cout)           # (1, Cout)

    cdt = compute_dtype
    w1 = params["w1"].astype(cdt)                        # (Cin, C4)
    wid = params["wid"].astype(cdt)                      # (Cin, Cout)
    w2 = params["w2"].reshape(3, 3 * C4, C4).astype(cdt)  # (dy, (dx,ci), co)
    w3 = params["w3"].astype(cdt)                        # (C4, Cout)

    # stride-2 folded into a free row-major reshape:
    #   x_r[n, h2, r, w2, s*Cin + c] == x[n, 2*h2 + r, 2*w2 + s, c]
    # Even rows (r=0) picked by the index_map.  Even columns (s=0): picked by
    # the BlockSpec lane block when Cin % 128 == 0 (halves x HBM traffic),
    # otherwise by an in-kernel lane slice.
    x_r = x.reshape(N, H2, 2, W2, 2 * Cin)
    lane_split = (Cin % 128 == 0)
    xw = Cin if lane_split else 2 * Cin

    x_center = pl.BlockSpec((None, th, None, W2, xw),
                            lambda n, i: (n, i, 0, 0, 0))
    x_top = pl.BlockSpec((None, None, None, W2, xw),
                         lambda n, i: (n, jnp.maximum(i * th - 1, 0), 0, 0, 0))
    x_bot = pl.BlockSpec((None, None, None, W2, xw),
                         lambda n, i: (n, jnp.minimum((i + 1) * th, H2 - 1), 0, 0, 0))
    rep = lambda n, i: (0, 0)
    rep3 = lambda n, i: (0, 0, 0)

    out = pl.pallas_call(
        down_bottleneck_kernel,
        grid=(N, n_strips),
        in_specs=[
            x_center, x_top, x_bot,
            pl.BlockSpec((2, Cin), rep),          # p1 = [s1; h1]
            pl.BlockSpec((Cin, C4), rep),         # w1
            pl.BlockSpec((Cin, Cout), rep),       # wid
            pl.BlockSpec((2, C4), rep),           # p2 = [s2; h2 + s2*b1]
            pl.BlockSpec((3, 3 * C4, C4), rep3),  # w2
            pl.BlockSpec((2, C4), rep),           # p3 = [s3; h3 + s3*b2]
            pl.BlockSpec((C4, Cout), rep),        # w3
            pl.BlockSpec((1, Cout), rep),         # bout = b3 + bid
        ],
        out_specs=pl.BlockSpec((None, th, W2, Cout), lambda n, i: (n, i, 0, 0)),
        out_shape=jax.ShapeDtypeStruct((N, H2, W2, Cout), jnp.float32),
        compiler_params=pltpu.CompilerParams(
            dimension_semantics=("parallel", "parallel"),
            vmem_limit_bytes=vmem_limit_mb * 1024 * 1024),
    )(x_r, x_r, x_r, p1, w1, wid, p2, w2, p3, w3, bout)
    return out


def down_bottleneck_forward(x_nchw, params, **kw):
    """NCHW compatibility entry (matches the PyTorch module interface)."""
    x = jnp.transpose(x_nchw, (0, 2, 3, 1))
    y = down_bottleneck_forward_nhwc(x, params, **kw)
    return jnp.transpose(y, (0, 3, 1, 2))


# --------------------------------------------------------------------------
# Pure-JAX reference (mirrors the PyTorch forward, eval-mode BN)
# --------------------------------------------------------------------------
def reference_forward(x_nchw, params):
    x = jnp.transpose(x_nchw, (0, 2, 3, 1)).astype(jnp.float32)
    Cin = x.shape[-1]
    C4 = params["w1"].shape[1]
    Cout = params["wid"].shape[1]

    def bn(v, pfx):
        g, b, m, var = (params[pfx + "_g"], params[pfx + "_b"],
                        params[pfx + "_m"], params[pfx + "_v"])
        return (v - m) / jnp.sqrt(var + EPS) * g + b

    def conv(v, w_hwio, bias, stride, pad):
        y = lax.conv_general_dilated(
            v, w_hwio, (stride, stride), [(pad, pad), (pad, pad)],
            dimension_numbers=("NHWC", "HWIO", "NHWC"))
        return y + bias.reshape(1, 1, 1, -1)

    identity = conv(x, params["wid"].reshape(1, 1, Cin, Cout), params["bid"], 2, 0)
    o = conv(jax.nn.relu(bn(x, "bn1")), params["w1"].reshape(1, 1, Cin, C4),
             params["b1"], 2, 0)
    o = conv(jax.nn.relu(bn(o, "bn2")), params["w2"], params["b2"], 1, 1)
    o = conv(jax.nn.relu(bn(o, "bn3")), params["w3"].reshape(1, 1, C4, Cout),
             params["b3"], 1, 0)
    o = o + identity
    return jnp.transpose(o, (0, 3, 1, 2))


# --------------------------------------------------------------------------
if __name__ == "__main__":
    def make_params(key, Cin, Cout):
        C4 = Cout // 4
        ks = jax.random.split(key, 20)

        def nrm(k, shape, scale=0.1):
            return scale * jax.random.normal(k, shape, dtype=jnp.float32)

        return dict(
            bn1_g=1.0 + nrm(ks[0], (Cin,)), bn1_b=nrm(ks[1], (Cin,)),
            bn1_m=nrm(ks[2], (Cin,)),
            bn1_v=1.0 + 0.1 * jax.random.uniform(ks[3], (Cin,), dtype=jnp.float32),
            w1=nrm(ks[4], (Cin, C4)), b1=nrm(ks[5], (C4,)),
            wid=nrm(ks[6], (Cin, Cout)), bid=nrm(ks[7], (Cout,)),
            bn2_g=1.0 + nrm(ks[8], (C4,)), bn2_b=nrm(ks[9], (C4,)),
            bn2_m=nrm(ks[10], (C4,)),
            bn2_v=1.0 + 0.1 * jax.random.uniform(ks[11], (C4,), dtype=jnp.float32),
            w2=nrm(ks[12], (3, 3, C4, C4)), b2=nrm(ks[13], (C4,)),
            bn3_g=1.0 + nrm(ks[14], (C4,)), bn3_b=nrm(ks[15], (C4,)),
            bn3_m=nrm(ks[16], (C4,)),
            bn3_v=1.0 + 0.1 * jax.random.uniform(ks[17], (C4,), dtype=jnp.float32),
            w3=nrm(ks[18], (C4, Cout)), b3=nrm(ks[19], (Cout,)),
        )

    key = jax.random.PRNGKey(0)
    kpa, kpb, kxa, kxb = jax.random.split(key, 4)

    # --- Config A: Cin % 128 == 0 -> exercises the lane-split x DMA path ----
    N, Cin, H, W, Cout = 2, 128, 16, 16, 256
    params = make_params(kpa, Cin, Cout)
    x = jax.random.normal(kxa, (N, Cin, H, W), dtype=jnp.float32)
    ref = jax.block_until_ready(reference_forward(x, params))

    out = jax.block_until_ready(down_bottleneck_forward(x, params))       # auto th
    assert out.shape == (N, Cout, H // 2, W // 2), out.shape
    err = float(jnp.max(jnp.abs(out - ref)))
    assert err < 2e-3, f"f32 (auto th) max abs error {err}"

    out2 = jax.block_until_ready(down_bottleneck_forward(x, params, th=2))  # 4 strips
    err2 = float(jnp.max(jnp.abs(out2 - ref)))
    assert err2 < 2e-3, f"f32 (th=2) max abs error {err2}"

    out3 = jax.block_until_ready(down_bottleneck_forward(x, params, th=3))  # snaps to 4
    err3 = float(jnp.max(jnp.abs(out3 - ref)))
    assert err3 < 2e-3, f"f32 (th=3->4) max abs error {err3}"

    outb = jax.block_until_ready(
        down_bottleneck_forward(x, params, th=4, compute_dtype=jnp.bfloat16))
    errb = float(jnp.max(jnp.abs(outb - ref)))
    assert errb < 1e-1, f"bf16 max abs error {errb}"

    # --- Config B: small channels -> fallback x DMA path (full-lane load) ---
    N2, Cin2, H2_, W2_, Cout2 = 2, 16, 16, 16, 32
    params2 = make_params(kpb, Cin2, Cout2)
    x2 = jax.random.normal(kxb, (N2, Cin2, H2_, W2_), dtype=jnp.float32)
    ref2 = jax.block_until_ready(reference_forward(x2, params2))
    out4 = jax.block_until_ready(down_bottleneck_forward(x2, params2, th=4))
    err4 = float(jnp.max(jnp.abs(out4 - ref2)))
    assert err4 < 2e-3, f"f32 small-channel max abs error {err4}"

    print("KERNEL_OK")
</pallas_src>

<mosaic_0001>
module attributes {stable_mosaic.version = 11 : i64} {
  func.func @down_bottleneck_kernel(%arg0: i32, %arg1: i32, %arg2: memref<1x8x1x8x128xf32, #tpu.memory_space<vmem>>, %arg3: memref<1x1x1x8x128xf32, #tpu.memory_space<vmem>>, %arg4: memref<1x1x1x8x128xf32, #tpu.memory_space<vmem>>, %arg5: memref<2x128xf32, #tpu.memory_space<vmem>>, %arg6: memref<128x64xf32, #tpu.memory_space<vmem>>, %arg7: memref<128x256xf32, #tpu.memory_space<vmem>>, %arg8: memref<2x64xf32, #tpu.memory_space<vmem>>, %arg9: memref<3x192x64xf32, #tpu.memory_space<vmem>>, %arg10: memref<2x64xf32, #tpu.memory_space<vmem>>, %arg11: memref<64x256xf32, #tpu.memory_space<vmem>>, %arg12: memref<1x256xf32, #tpu.memory_space<vmem>>, %arg13: memref<1x8x8x256xf32, #tpu.memory_space<vmem>>) attributes {dimension_semantics = [#tpu.dimension_semantics<parallel>, #tpu.dimension_semantics<parallel>], iteration_bounds = array<i64: 2, 1>, scalar_prefetch = 0 : i64, scratch_operands = 0 : i64, tpu.core_type = #tpu.core_type<tc>, window_params = [{transform_indices = @transform_0, window_bounds = array<i64: 1, 8, 1, 8, 128>}, {transform_indices = @transform_1, window_bounds = array<i64: 1, 1, 1, 8, 128>}, {transform_indices = @transform_2, window_bounds = array<i64: 1, 1, 1, 8, 128>}, {pipeline_mode = #tpu.pipeline_mode<synchronous>, transform_indices = @transform_3, window_bounds = array<i64: 2, 128>}, {pipeline_mode = #tpu.pipeline_mode<synchronous>, transform_indices = @transform_4, window_bounds = array<i64: 128, 64>}, {pipeline_mode = #tpu.pipeline_mode<synchronous>, transform_indices = @transform_5, window_bounds = array<i64: 128, 256>}, {pipeline_mode = #tpu.pipeline_mode<synchronous>, transform_indices = @transform_6, window_bounds = array<i64: 2, 64>}, {pipeline_mode = #tpu.pipeline_mode<synchronous>, transform_indices = @transform_7, window_bounds = array<i64: 3, 192, 64>}, {pipeline_mode = #tpu.pipeline_mode<synchronous>, transform_indices = @transform_8, window_bounds = array<i64: 2, 64>}, {pipeline_mode = #tpu.pipeline_mode<synchronous>, transform_indices = @transform_9, window_bounds = array<i64: 64, 256>}, {pipeline_mode = #tpu.pipeline_mode<synchronous>, transform_indices = @transform_10, window_bounds = array<i64: 1, 256>}, {transform_indices = @transform_11, window_bounds = array<i64: 1, 8, 8, 256>}]} {
    %c0 = arith.constant 0 : index
    %c0_0 = arith.constant 0 : index
    %c0_1 = arith.constant 0 : index
    %c0_2 = arith.constant 0 : index
    %c0_3 = arith.constant 0 : index
    %0 = vector.load %arg2[%c0, %c0_0, %c0_1, %c0_2, %c0_3] : memref<1x8x1x8x128xf32, #tpu.memory_space<vmem>>, vector<1x8x1x8x128xf32>
    %1 = vector.shape_cast %0 : vector<1x8x1x8x128xf32> to vector<8x8x128xf32>
    %c0_4 = arith.constant 0 : index
    %c0_5 = arith.constant 0 : index
    %c0_6 = arith.constant 0 : index
    %c0_7 = arith.constant 0 : index
    %c0_8 = arith.constant 0 : index
    %2 = vector.load %arg3[%c0_4, %c0_5, %c0_6, %c0_7, %c0_8] : memref<1x1x1x8x128xf32, #tpu.memory_space<vmem>>, vector<1x1x1x8x128xf32>
    %3 = vector.shape_cast %2 : vector<1x1x1x8x128xf32> to vector<8x128xf32>
    %c0_9 = arith.constant 0 : index
    %c0_10 = arith.constant 0 : index
    %c0_11 = arith.constant 0 : index
    %c0_12 = arith.constant 0 : index
    %c0_13 = arith.constant 0 : index
    %4 = vector.load %arg4[%c0_9, %c0_10, %c0_11, %c0_12, %c0_13] : memref<1x1x1x8x128xf32, #tpu.memory_space<vmem>>, vector<1x1x1x8x128xf32>
    %5 = vector.shape_cast %4 : vector<1x1x1x8x128xf32> to vector<8x128xf32>
    %6 = vector.shape_cast %1 : vector<8x8x128xf32> to vector<64x128xf32>
    %c0_14 = arith.constant 0 : index
    %c0_15 = arith.constant 0 : index
    %7 = vector.load %arg7[%c0_14, %c0_15] : memref<128x256xf32, #tpu.memory_space<vmem>>, vector<128x256xf32>
    %cst = arith.constant dense<0.000000e+00> : vector<64x256xf32>
    %8 = tpu.matmul %6, %7, %cst {dimension_numbers = #tpu.dot_dimension_numbers<[1], [0], [0], [1], [0, 0, 1, 1], [], []>} : vector<64x128xf32>, vector<128x256xf32>, vector<64x256xf32> -> vector<64x256xf32>
    %9 = tpu.concatenate %3, %6, %5 in 0 : vector<8x128xf32>, vector<64x128xf32>, vector<8x128xf32> -> vector<80x128xf32>
    %c0_16 = arith.constant 0 : index
    %c0_17 = arith.constant 0 : index
    %10 = vector.load %arg5[%c0_16, %c0_17] : memref<2x128xf32, #tpu.memory_space<vmem>>, vector<1x128xf32>
    %c1 = arith.constant 1 : index
    %c0_18 = arith.constant 0 : index
    %11 = vector.load %arg5[%c1, %c0_18] : memref<2x128xf32, #tpu.memory_space<vmem>>, vector<1x128xf32>
    %12 = vector.broadcast %10 : vector<1x128xf32> to vector<80x128xf32>
    %13 = arith.mulf %9, %12 : vector<80x128xf32>
    %14 = vector.broadcast %11 : vector<1x128xf32> to vector<80x128xf32>
    %15 = arith.addf %13, %14 : vector<80x128xf32>
    %cst_19 = arith.constant 0.000000e+00 : f32
    %16 = vector.broadcast %cst_19 : f32 to vector<80x128xf32>
    %17 = arith.maximumf %15, %16 : vector<80x128xf32>
    %c0_20 = arith.constant 0 : index
    %c0_21 = arith.constant 0 : index
    %18 = vector.load %arg6[%c0_20, %c0_21] : memref<128x64xf32, #tpu.memory_space<vmem>>, vector<128x64xf32>
    %cst_22 = arith.constant dense<0.000000e+00> : vector<80x64xf32>
    %19 = tpu.matmul %17, %18, %cst_22 {dimension_numbers = #tpu.dot_dimension_numbers<[1], [0], [0], [1], [0, 0, 1, 1], [], []>} : vector<80x128xf32>, vector<128x64xf32>, vector<80x64xf32> -> vector<80x64xf32>
    %c0_23 = arith.constant 0 : index
    %c0_24 = arith.constant 0 : index
    %20 = vector.load %arg8[%c0_23, %c0_24] : memref<2x64xf32, #tpu.memory_space<vmem>>, vector<1x64xf32>
    %c1_25 = arith.constant 1 : index
    %c0_26 = arith.constant 0 : index
    %21 = vector.load %arg8[%c1_25, %c0_26] : memref<2x64xf32, #tpu.memory_space<vmem>>, vector<1x64xf32>
    %22 = vector.broadcast %20 : vector<1x64xf32> to vector<80x64xf32>
    %23 = arith.mulf %19, %22 : vector<80x64xf32>
    %24 = vector.broadcast %21 : vector<1x64xf32> to vector<80x64xf32>
    %25 = arith.addf %23, %24 : vector<80x64xf32>
    %cst_27 = arith.constant 0.000000e+00 : f32
    %26 = vector.broadcast %cst_27 : f32 to vector<80x64xf32>
    %27 = arith.maximumf %25, %26 : vector<80x64xf32>
    %28 = tpu.iota {dimensions = array<i32: 0>} : vector<80x1xi32>
    %c8_i32 = arith.constant 8 : i32
    %29 = vector.broadcast %c8_i32 : i32 to vector<80x1xi32>
    %30 = arith.cmpi sge, %28, %29 : vector<80x1xi32>
    %c0_i32 = arith.constant 0 : i32
    %31 = arith.cmpi sgt, %arg1, %c0_i32 : i32
    %32 = vector.broadcast %31 : i1 to vector<80x1xi1>
    %33 = arith.ori %30, %32 : vector<80x1xi1>
    %c72_i32 = arith.constant 72 : i32
    %34 = vector.broadcast %c72_i32 : i32 to vector<80x1xi32>
    %35 = arith.cmpi slt, %28, %34 : vector<80x1xi32>
    %c0_i32_28 = arith.constant 0 : i32
    %36 = arith.cmpi slt, %arg1, %c0_i32_28 : i32
    %37 = vector.broadcast %36 : i1 to vector<80x1xi1>
    %38 = arith.ori %35, %37 : vector<80x1xi1>
    %39 = arith.andi %33, %38 : vector<80x1xi1>
    %cst_29 = arith.constant 0.000000e+00 : f32
    %40 = vector.shape_cast %39 : vector<80x1xi1> to vector<80x1xi1>
    %41 = vector.broadcast %40 : vector<80x1xi1> to vector<80x64xi1>
    %42 = vector.broadcast %cst_29 : f32 to vector<80x64xf32>
    %43 = arith.select %41, %27, %42 : vector<80x64xi1>, vector<80x64xf32>
    %c8_i32_30 = arith.constant 8 : i32
    %c0_i32_31 = arith.constant 0 : i32
    %44 = arith.cmpi eq, %c8_i32_30, %c0_i32_31 : i32
    %c1_i32 = arith.constant 1 : i32
    %45 = arith.select %44, %c1_i32, %c8_i32_30 : i32
    %46 = vector.broadcast %45 : i32 to vector<80x1xi32>
    %47 = arith.remsi %28, %46 : vector<80x1xi32>
    %c0_i32_32 = arith.constant 0 : i32
    %48 = vector.broadcast %c0_i32_32 : i32 to vector<80x1xi32>
    %49 = arith.cmpi ne, %47, %48 : vector<80x1xi32>
    %c0_i32_33 = arith.constant 0 : i32
    %50 = vector.broadcast %c0_i32_33 : i32 to vector<80x1xi32>
    %51 = arith.cmpi slt, %47, %50 : vector<80x1xi32>
    %c0_i32_34 = arith.constant 0 : i32
    %52 = arith.cmpi slt, %45, %c0_i32_34 : i32
    %53 = vector.broadcast %52 : i1 to vector<80x1xi1>
    %54 = vector.broadcast %53 : vector<80x1xi1> to vector<80x1xi1>
    %55 = arith.xori %51, %54 : vector<80x1xi1>
    %56 = arith.andi %55, %49 : vector<80x1xi1>
    %57 = vector.broadcast %45 : i32 to vector<80x1xi32>
    %58 = arith.addi %47, %57 : vector<80x1xi32>
    %59 = arith.select %56, %58, %47 : vector<80x1xi1>, vector<80x1xi32>
    %c0_i32_35 = arith.constant 0 : i32
    %60 = vector.broadcast %c0_i32_35 : i32 to vector<80x1xi32>
    %61 = arith.cmpi sgt, %59, %60 : vector<80x1xi32>
    %62 = arith.extui %61 : vector<80x1xi1> to vector<80x1xi32>
    %63 = arith.sitofp %62 : vector<80x1xi32> to vector<80x1xf32>
    %c7_i32 = arith.constant 7 : i32
    %64 = vector.broadcast %c7_i32 : i32 to vector<80x1xi32>
    %65 = arith.cmpi slt, %59, %64 : vector<80x1xi32>
    %66 = arith.extui %65 : vector<80x1xi1> to vector<80x1xi32>
    %67 = arith.sitofp %66 : vector<80x1xi32> to vector<80x1xf32>
    %c1_i32_36 = arith.constant 1 : i32
    %68 = tpu.dynamic_rotate %43 by %c1_i32_36 dim 0 : vector<80x64xf32>, i32 -> vector<80x64xf32>
    %69 = vector.broadcast %63 : vector<80x1xf32> to vector<80x64xf32>
    %70 = arith.mulf %68, %69 : vector<80x64xf32>
    %c79_i32 = arith.constant 79 : i32
    %71 = tpu.dynamic_rotate %43 by %c79_i32 dim 0 : vector<80x64xf32>, i32 -> vector<80x64xf32>
    %72 = vector.broadcast %67 : vector<80x1xf32> to vector<80x64xf32>
    %73 = arith.mulf %71, %72 : vector<80x64xf32>
    %74 = tpu.concatenate %70, %43, %73 in 1 : vector<80x64xf32>, vector<80x64xf32>, vector<80x64xf32> -> vector<80x192xf32>
    %75 = vector.extract_strided_slice %74 {offsets = [0, 0], sizes = [64, 192], strides = [1, 1]} : vector<80x192xf32> to vector<64x192xf32>
    %c0_37 = arith.constant 0 : index
    %c0_38 = arith.constant 0 : index
    %c0_39 = arith.constant 0 : index
    %76 = vector.load %arg9[%c0_37, %c0_38, %c0_39] : memref<3x192x64xf32, #tpu.memory_space<vmem>>, vector<1x192x64xf32>
    %77 = vector.shape_cast %76 : vector<1x192x64xf32> to vector<192x64xf32>
    %cst_40 = arith.constant dense<0.000000e+00> : vector<64x64xf32>
    %78 = tpu.matmul %75, %77, %cst_40 {dimension_numbers = #tpu.dot_dimension_numbers<[1], [0], [0], [1], [0, 0, 1, 1], [], []>} : vector<64x192xf32>, vector<192x64xf32>, vector<64x64xf32> -> vector<64x64xf32>
    %79 = vector.extract_strided_slice %74 {offsets = [8, 0], sizes = [64, 192], strides = [1, 1]} : vector<80x192xf32> to vector<64x192xf32>
    %c1_41 = arith.constant 1 : index
    %c0_42 = arith.constant 0 : index
    %c0_43 = arith.constant 0 : index
    %80 = vector.load %arg9[%c1_41, %c0_42, %c0_43] : memref<3x192x64xf32, #tpu.memory_space<vmem>>, vector<1x192x64xf32>
    %81 = vector.shape_cast %80 : vector<1x192x64xf32> to vector<192x64xf32>
    %cst_44 = arith.constant dense<0.000000e+00> : vector<64x64xf32>
    %82 = tpu.matmul %79, %81, %cst_44 {dimension_numbers = #tpu.dot_dimension_numbers<[1], [0], [0], [1], [0, 0, 1, 1], [], []>} : vector<64x192xf32>, vector<192x64xf32>, vector<64x64xf32> -> vector<64x64xf32>
    %83 = arith.addf %78, %82 : vector<64x64xf32>
    %84 = vector.extract_strided_slice %74 {offsets = [16, 0], sizes = [64, 192], strides = [1, 1]} : vector<80x192xf32> to vector<64x192xf32>
    %c2 = arith.constant 2 : index
    %c0_45 = arith.constant 0 : index
    %c0_46 = arith.constant 0 : index
    %85 = vector.load %arg9[%c2, %c0_45, %c0_46] : memref<3x192x64xf32, #tpu.memory_space<vmem>>, vector<1x192x64xf32>
    %86 = vector.shape_cast %85 : vector<1x192x64xf32> to vector<192x64xf32>
    %cst_47 = arith.constant dense<0.000000e+00> : vector<64x64xf32>
    %87 = tpu.matmul %84, %86, %cst_47 {dimension_numbers = #tpu.dot_dimension_numbers<[1], [0], [0], [1], [0, 0, 1, 1], [], []>} : vector<64x192xf32>, vector<192x64xf32>, vector<64x64xf32> -> vector<64x64xf32>
    %88 = arith.addf %83, %87 : vector<64x64xf32>
    %c0_48 = arith.constant 0 : index
    %c0_49 = arith.constant 0 : index
    %89 = vector.load %arg10[%c0_48, %c0_49] : memref<2x64xf32, #tpu.memory_space<vmem>>, vector<1x64xf32>
    %c1_50 = arith.constant 1 : index
    %c0_51 = arith.constant 0 : index
    %90 = vector.load %arg10[%c1_50, %c0_51] : memref<2x64xf32, #tpu.memory_space<vmem>>, vector<1x64xf32>
    %91 = vector.broadcast %89 : vector<1x64xf32> to vector<64x64xf32>
    %92 = arith.mulf %88, %91 : vector<64x64xf32>
    %93 = vector.broadcast %90 : vector<1x64xf32> to vector<64x64xf32>
    %94 = arith.addf %92, %93 : vector<64x64xf32>
    %cst_52 = arith.constant 0.000000e+00 : f32
    %95 = vector.broadcast %cst_52 : f32 to vector<64x64xf32>
    %96 = arith.maximumf %94, %95 : vector<64x64xf32>
    %c0_53 = arith.constant 0 : index
    %c0_54 = arith.constant 0 : index
    %97 = vector.load %arg11[%c0_53, %c0_54] : memref<64x256xf32, #tpu.memory_space<vmem>>, vector<64x256xf32>
    %cst_55 = arith.constant dense<0.000000e+00> : vector<64x256xf32>
    %98 = tpu.matmul %96, %97, %cst_55 {dimension_numbers = #tpu.dot_dimension_numbers<[1], [0], [0], [1], [0, 0, 1, 1], [], []>} : vector<64x64xf32>, vector<64x256xf32>, vector<64x256xf32> -> vector<64x256xf32>
    %99 = arith.addf %98, %8 : vector<64x256xf32>
    %c0_56 = arith.constant 0 : index
    %c0_57 = arith.constant 0 : index
    %100 = vector.load %arg12[%c0_56, %c0_57] : memref<1x256xf32, #tpu.memory_space<vmem>>, vector<1x256xf32>
    %101 = vector.broadcast %100 : vector<1x256xf32> to vector<64x256xf32>
    %102 = arith.addf %99, %101 : vector<64x256xf32>
    %103 = vector.shape_cast %102 : vector<64x256xf32> to vector<8x8x256xf32>
    %c0_58 = arith.constant 0 : index
    %c0_59 = arith.constant 0 : index
    %c0_60 = arith.constant 0 : index
    %c0_61 = arith.constant 0 : index
    %104 = vector.load %arg13[%c0_58, %c0_59, %c0_60, %c0_61] : memref<1x8x8x256xf32, #tpu.memory_space<vmem>>, vector<1x8x8x256xf32>
    %105 = vector.shape_cast %104 : vector<1x8x8x256xf32> to vector<8x8x256xf32>
    %106 = vector.shape_cast %103 : vector<8x8x256xf32> to vector<1x8x8x256xf32>
    tpu.vector_store %arg13[%c0_58, %c0_59, %c0_60, %c0_61], %106 {strides = array<i32>} : memref<1x8x8x256xf32, #tpu.memory_space<vmem>>, vector<1x8x8x256xf32>,
    return
  }
  func.func @transform_0(%arg0: i32, %arg1: i32) -> (i32, i32, i32, i32, i32) {
    %c0_i32 = arith.constant 0 : i32
    %c0_i32_0 = arith.constant 0 : i32
    %c0_i32_1 = arith.constant 0 : i32
    %c0_i32_2 = arith.constant 0 : i32
    return %arg0, %arg1, %c0_i32, %c0_i32_0, %c0_i32_1 : i32, i32, i32, i32, i32
  }
  func.func @transform_1(%arg0: i32, %arg1: i32) -> (i32, i32, i32, i32, i32) {
    %c8_i32 = arith.constant 8 : i32
    %0 = arith.muli %arg1, %c8_i32 : i32
    %c1_i32 = arith.constant 1 : i32
    %1 = arith.subi %0, %c1_i32 : i32
    %c0_i32 = arith.constant 0 : i32
    %2 = arith.maxsi %1, %c0_i32 : i32
    %c0_i32_0 = arith.constant 0 : i32
    %c0_i32_1 = arith.constant 0 : i32
    %c0_i32_2 = arith.constant 0 : i32
    %c0_i32_3 = arith.constant 0 : i32
    return %arg0, %2, %c0_i32_0, %c0_i32_1, %c0_i32_2 : i32, i32, i32, i32, i32
  }
  func.func @transform_2(%arg0: i32, %arg1: i32) -> (i32, i32, i32, i32, i32) {
    %c1_i32 = arith.constant 1 : i32
    %0 = arith.addi %arg1, %c1_i32 : i32
    %c8_i32 = arith.constant 8 : i32
    %1 = arith.muli %0, %c8_i32 : i32
    %c7_i32 = arith.constant 7 : i32
    %2 = arith.minsi %1, %c7_i32 : i32
    %c0_i32 = arith.constant 0 : i32
    %c0_i32_0 = arith.constant 0 : i32
    %c0_i32_1 = arith.constant 0 : i32
    %c0_i32_2 = arith.constant 0 : i32
    return %arg0, %2, %c0_i32, %c0_i32_0, %c0_i32_1 : i32, i32, i32, i32, i32
  }
  func.func @transform_3(%arg0: i32, %arg1: i32) -> (i32, i32) {
    %c0_i32 = arith.constant 0 : i32
    %c0_i32_0 = arith.constant 0 : i32
    %c0_i32_1 = arith.constant 0 : i32
    return %c0_i32, %c0_i32_0 : i32, i32
  }
  func.func @transform_4(%arg0: i32, %arg1: i32) -> (i32, i32) {
    %c0_i32 = arith.constant 0 : i32
    %c0_i32_0 = arith.constant 0 : i32
    %c0_i32_1 = arith.constant 0 : i32
    return %c0_i32, %c0_i32_0 : i32, i32
  }
  func.func @transform_5(%arg0: i32, %arg1: i32) -> (i32, i32) {
    %c0_i32 = arith.constant 0 : i32
    %c0_i32_0 = arith.constant 0 : i32
    %c0_i32_1 = arith.constant 0 : i32
    return %c0_i32, %c0_i32_0 : i32, i32
  }
  func.func @transform_6(%arg0: i32, %arg1: i32) -> (i32, i32) {
    %c0_i32 = arith.constant 0 : i32
    %c0_i32_0 = arith.constant 0 : i32
    %c0_i32_1 = arith.constant 0 : i32
    return %c0_i32, %c0_i32_0 : i32, i32
  }
  func.func @transform_7(%arg0: i32, %arg1: i32) -> (i32, i32, i32) {
    %c0_i32 = arith.constant 0 : i32
    %c0_i32_0 = arith.constant 0 : i32
    %c0_i32_1 = arith.constant 0 : i32
    %c0_i32_2 = arith.constant 0 : i32
    return %c0_i32, %c0_i32_0, %c0_i32_1 : i32, i32, i32
  }
  func.func @transform_8(%arg0: i32, %arg1: i32) -> (i32, i32) {
    %c0_i32 = arith.constant 0 : i32
    %c0_i32_0 = arith.constant 0 : i32
    %c0_i32_1 = arith.constant 0 : i32
    return %c0_i32, %c0_i32_0 : i32, i32
  }
  func.func @transform_9(%arg0: i32, %arg1: i32) -> (i32, i32) {
    %c0_i32 = arith.constant 0 : i32
    %c0_i32_0 = arith.constant 0 : i32
    %c0_i32_1 = arith.constant 0 : i32
    return %c0_i32, %c0_i32_0 : i32, i32
  }
  func.func @transform_10(%arg0: i32, %arg1: i32) -> (i32, i32) {
    %c0_i32 = arith.constant 0 : i32
    %c0_i32_0 = arith.constant 0 : i32
    %c0_i32_1 = arith.constant 0 : i32
    return %c0_i32, %c0_i32_0 : i32, i32
  }
  func.func @transform_11(%arg0: i32, %arg1: i32) -> (i32, i32, i32, i32) {
    %c0_i32 = arith.constant 0 : i32
    %c0_i32_0 = arith.constant 0 : i32
    %c0_i32_1 = arith.constant 0 : i32
    return %arg0, %arg1, %c0_i32, %c0_i32_0 : i32, i32, i32, i32
  }
}

</mosaic_0001>

<bundles_post_ra>
// kernel: tpu_custom_call.1
= control target key start
LH: loop header
LB: loop body
LE: loop exit
PB: predicated region body
PF: predicated region fallthrough
CT: control target
= control target key end

     0   :  { %s3687_s0 = inlined_call_operand.vmem [shape: f32[2,8,2,8,256], index: 0, kind: input, shape index: {}]   ;;  %s3688_s1 = inlined_call_operand.vmem [shape: f32[2,8,2,8,256], index: 1, kind: input, shape index: {}]   ;;  %s3689_s2 = inlined_call_operand.hbm [shape: f32[2,8,2,8,256], index: 2, kind: input, shape index: {}]   ;;  %s3690_s3 = inlined_call_operand.hbm [shape: f32[2,128], index: 3, kind: input, shape index: {}]   ;;  %s3691_s4 = inlined_call_operand.vmem [shape: f32[128,64], index: 4, kind: input, shape index: {}]   ;;  %s3692_s5 = inlined_call_operand.hbm [shape: f32[128,256], index: 5, kind: input, shape index: {}]   ;;  %s3693_s6 = inlined_call_operand.hbm [shape: f32[2,64], index: 6, kind: input, shape index: {}]   ;;  %s3694_s7 = inlined_call_operand.vmem [shape: f32[3,192,64], index: 7, kind: input, shape index: {}]   ;;  %s3695_s8 = inlined_call_operand.hbm [shape: f32[2,64], index: 8, kind: input, shape index: {}]   ;;  %s3696_s9 = inlined_call_operand.vmem [shape: f32[64,256], index: 9, kind: input, shape index: {}]   ;;  %s3697_s10 = inlined_call_operand.hbm [shape: f32[1,256], index: 10, kind: input, shape index: {}]   ;;  %s3698_s11 = inlined_call_operand.hbm [shape: f32[2,8,8,256], index: 11, kind: output, shape index: {}]  }
   0x1   :  { %3707 = sst [smem:[#allocation25_spill]] %s3688_s1 }
   0x2   :  { %3708 = sst [smem:[#allocation26_spill]] %s3690_s3 }
   0x3   :  { %3709 = sst [smem:[#allocation27_spill]] %s3692_s5 }
   0x4   :  { %3710 = sst [smem:[#allocation28_spill]] %s3693_s6 }
   0x5   :  { %3711 = sst [smem:[#allocation29_spill]] %s3694_s7 }
   0x6   :  { %3712 = sst [smem:[#allocation30_spill]] %s3696_s9 }
   0x7   :  { %3713 = sst [smem:[#allocation31_spill]] %s3698_s11 }
   0x8   :  { %16 = vsyncpa [#allocation4], 0 }
   0x9   :  { %18 = vsyncpa [#allocation4 + $0x1], 0 }
   0xa   :  { %19 = vsyncpa [#allocation7], 0 }
   0xb   :  { %20 = vsyncpa [#allocation10], 0 }
   0xc   :  { %21 = vsyncpa [#allocation13], 0 }
   0xd   :  { %22 = vsyncpa [#allocation5], 0 }
   0xe   :  { %24 = vsyncpa [#allocation5 + $0x1], 0  ;;  %s2698_s17 = smov 0   ;;  %s2700_s18 = smov 0  }
   0xf   :  { %s2702_s19 = smov 0   ;;  %s2704_s20 = smov 0  }
  0x10   :  { %s2706_s21 = smov 0   ;;  %s2708_s22 = smov 0  }
  0x11 LB: > { %3714 = sst [smem:[#allocation20_spill]] %s2605_s17  ;;  %s2056_s23 = sadd.s32 4294967295, %s2625_s22   ;;  %s2625_s22 = sphi %s2708_s22, %s30_s22   ;;  %s2621_s21 = sphi %s2706_s21, %s3742_s21   ;;  %s2617_s20 = sphi %s2704_s20, %s3741_s20   ;;  %s2613_s19 = sphi %s2702_s19, %s3740_s19   ;;  %s2609_s18 = sphi %s2700_s18, %s3739_s18   ;;  %s2605_s17 = sphi %s2698_s17, %s3738_s17  }
  0x12   : > { %s2057_s24 = sadd.s32 4294967294, %s2625_s22   ;;  %s42_s25 = sadd.s32 1, %s2621_s21 }
  0x13   : > { %s51_s26 = sadd.s32 1, %s2613_s19  ;;  %p44_p0 = scmp.ge.s32.totalorder %s42_s25, 2 }
  0x14   : > { %p58_p1 = scmp.ne.s32.totalorder %s2613_s19, %s2609_s18  ;;  %p59_p2 = scmp.eq.s32.totalorder %s2625_s22, 0 }
  0x15   : > { %p136_p3 = scmp.ne.s32.totalorder %s2609_s18, %s2605_s17  ;;  %s3744_s25 = smov (%p44_p0, %s42_s25), 0 }
  0x16   : > { %3715 = sst [smem:[#allocation21_spill]] %s3744_s25  ;;  %p2739_p4 = por %p59_p2, %p58_p1 }
  0x17   : > { %p2743_p5 = scmp.eq.s32.totalorder %s2056_s23, 0  ;;  %s46_s29 = ssub.s32 %s2621_s21, %s3744_s25 }
  0x18   : > { %p330_p6 = scmp.eq.s32.totalorder %s2056_s23, 1  ;;  %p49_p7 = scmp.eq.s32.totalorder %s46_s29, 0 }
  0x19   : > { %p2751_p8 = por %p2743_p5, %p136_p3  ;;  %p336_p10 = scmp.eq.s32.totalorder %s2057_s24, 1 }
  0x1a   : > { %p2755_p9 = por %p330_p6, %p58_p1  ;;  %p2058_p12 = scmp.ge.s32.totalorder %s2625_s22, 1 }
  0x1b   : > { %s2760_s13 = scalar_select %p49_p7, %s2613_s19, %s51_s26  }
  0x1c   : > { %s3719_s12 = scalar_select %p2755_p9, 1, 0 }
  0x1d   : > { %3721 = sst [smem:[#allocation23_spill]] %s2760_s13  ;;  %p2762_p11 = por %p336_p10, %p136_p3 }
  0x1e   : > { %3720 = sst [smem:[#allocation22_spill]] %s3719_s12  ;;  %p343_p13 = scmp.lt.s32.totalorder %s2625_s22, 3 }
  0x1f   : > { %s3722_s14 = scalar_select %p2762_p11, 1, 0 }
  0x20   : > { %s3724_s3 = sld [smem:[#allocation26_spill]]  ;;  %p2771_p0 = pnand %p2058_p12, %p343_p13 }
  0x21   : > { %3723 = sst [smem:[#allocation24_spill]] %s3722_s14  ;;  %s2627_s25 = smov [#allocation6]  }
  0x22   : > { %s357_s24 = sshll.u32 %s2627_s25, 4  ;;  %s3726_s6 = sld [smem:[#allocation28_spill]]  ;;  %s358_s24 = int_to_ptr.vmem [resolvable:$true] %s357_s24 }
  0x23   : > { %p2257_p1 = pneg %p2771_p0  ;;  %s2628_s16 = smov [#allocation9]  }
  0x24   : > { %s3728_s5 = sld [smem:[#allocation27_spill]]  ;;  %s2629_s26 = smov [#allocation8]  }
  0x25   : > { %p2782_p2 = pnand %p2257_p1, %p2743_p5  ;;  %s399_s9 = sshll.u32 %s3695_s8, 4  ;;  %s400_s9 = int_to_ptr.hbm [resolvable:$true] %s399_s9 }
  0x26   : > { %s355_s23 = sshll.u32 %s3724_s3, 4  ;;  %s386_s3 = sshll.u32 %s2628_s16, 4  ;;  %s356_s23 = int_to_ptr.hbm [resolvable:$true] %s355_s23  ;;  %s387_s3 = int_to_ptr.vmem [resolvable:$true] %s386_s3 }
  0x27   : > { %2260 = dma.hbm_to_vmem [thread:$0]  (!%p2782_p2), %s356_s23, 32, %s358_s24, [#allocation7]  }
  0x28   : > { %s384_s17 = sshll.u32 %s3726_s6, 4  ;;  %s371_s6 = sshll.u32 %s2629_s26, 4  ;;  %s385_s17 = int_to_ptr.hbm [resolvable:$true] %s384_s17  ;;  %s372_s6 = int_to_ptr.vmem [resolvable:$true] %s371_s6 }
  0x29   : > { %2266 = dma.hbm_to_vmem [thread:$0]  (!%p2782_p2), %s385_s17, 32, %s387_s3, [#allocation10]  }
  0x2a   : > { %s369_s13 = sshll.u32 %s3728_s5, 4  ;;  %s2630_s16 = smov 256   ;;  %s370_s13 = int_to_ptr.hbm [resolvable:$true] %s369_s13 }
  0x2b   : > { %s2631_s7 = smov 16   ;;  %s2632_s14 = smov [#allocation11]  }
  0x2c   : > { %2263 = dma.hbm_to_vmem [thread:$0]  (!%p2782_p2), %s370_s13, 4096, %s372_s6, [#allocation7], %s2630_s16, %s2630_s16, %s2631_s7  }
  0x2d   : > { %s401_s25 = sshll.u32 %s2632_s14, 4  ;;  %s414_s23 = sshll.u32 %s3697_s10, 4  ;;  %s402_s25 = int_to_ptr.vmem [resolvable:$true] %s401_s25  ;;  %s415_s23 = int_to_ptr.hbm [resolvable:$true] %s414_s23 }
  0x2e   : > { %2269 = dma.hbm_to_vmem [thread:$0]  (!%p2782_p2), %s400_s9, 32, %s402_s25, [#allocation10]  }
  0x2f   : > { %s2633_s3 = smov [#allocation12]   ;;  %p2064_p3 = scmp.ge.s32.totalorder %s2625_s22, 2 }
  0x30   : > { %s416_s17 = sshll.u32 %s2633_s3, 4  ;;  %s417_s17 = int_to_ptr.vmem [resolvable:$true] %s416_s17 }
  0x31   : > { %2272 = dma.hbm_to_vmem [thread:$0]  (!%p2782_p2), %s415_s23, 32, %s417_s17, [#allocation13]  }
  0x32   : > { %423 = sbr.rel (%p2064_p3) target bundleno = 73 (0x49), region = 48 }
  0x37   : > { %426 = sbr.rel (!%p2739_p4) target bundleno = 67 (0x43), region = 52  ;;  %s428_s1 = sand.u32 (%p2739_p4), 1, %s2613_s19  }
  0x38   : > { %s2195_s5 = sshll.u32 (%p2739_p4), %s2621_s21, 8  ;;  %s2065_s6 = sshll.u32 (%p2739_p4), %s428_s1, 6 }
  0x39   : > { %s436_s11 = scalar_lea.vmem (%p2739_p4), %s3687_s0, %s2195_s5  ;;  %s430_s12 = scalar_lea.vmem (%p2739_p4), [#allocation2], %s2065_s6 }
  0x3a   : > { %v479_v0 = vld [vmem:[%s436_s11] sm:$0xff] (%p2739_p4) }
  0x3b   : > { %v481_v1 = vld [vmem:[%s436_s11 + $0x20] sm:$0xff] (%p2739_p4)  ;;  %480 = vst [vmem:[%s430_s12] sm:$0xff] (%p2739_p4), %v479_v0 }
  0x3c   : > { %v483_v2 = vld [vmem:[%s436_s11 + $0x40] sm:$0xff]  ;;  %482 = vst [vmem:[%s430_s12 + $0x8] sm:$0xff] %v481_v1 }
  0x3d   : > { %v485_v3 = vld [vmem:[%s436_s11 + $0x60] sm:$0xff]  ;;  %484 = vst [vmem:[%s430_s12 + $0x10] sm:$0xff] %v483_v2 }
  0x3e   : > { %v487_v4 = vld [vmem:[%s436_s11 + $0x80] sm:$0xff]  ;;  %486 = vst [vmem:[%s430_s12 + $0x18] sm:$0xff] %v485_v3 }
  0x3f   : > { %v489_v5 = vld [vmem:[%s436_s11 + $0xa0] sm:$0xff]  ;;  %488 = vst [vmem:[%s430_s12 + $0x20] sm:$0xff] %v487_v4 }
  0x40   : > { %v491_v6 = vld [vmem:[%s436_s11 + $0xc0] sm:$0xff]  ;;  %490 = vst [vmem:[%s430_s12 + $0x28] sm:$0xff] %v489_v5 }
  0x41   : > { %v493_v7 = vld [vmem:[%s436_s11 + $0xe0] sm:$0xff]  ;;  %492 = vst [vmem:[%s430_s12 + $0x30] sm:$0xff] %v491_v6 }
  0x42   : > { %494 = vst [vmem:[%s430_s12 + $0x38] sm:$0xff] %v493_v7 }
  0x43 PF: > { %s521_s24 = sand.u32 1, %s2613_s19   ;;  %s2200_s15 = sshll.u32 %s2621_s21, 8 }
  0x44   : > { %s2068_s13 = sshll.u32 %s521_s24, 3  ;;  %s2197_s26 = sadd.s32 224, %s2200_s15 }
  0x45   : > { %s536_s25 = scalar_lea.hbm %s3689_s2, %s2197_s26  ;;  %s525_s23 = scalar_lea.vmem [#allocation3], %s2068_s13 }
  0x46   : > { %s540_s3 = sshll.u32 %s525_s23, 4  ;;  %s538_s17 = sshll.u32 %s536_s25, 4  ;;  %s541_s3 = int_to_ptr.vmem [resolvable:$true] %s540_s3  ;;  %s539_s17 = int_to_ptr.hbm [resolvable:$true] %s538_s17 }
  0x47   : > { %s522_s1 = scalar_lea.sflag [#allocation4], %s521_s24 }
  0x48   : > { %2243 = dma.hbm_to_vmem [thread:$0]  (%p2739_p4), %s539_s17, 128, %s541_s3, %s522_s1  }
  0x49 PF: > { %549 = sbr.rel (%p2771_p0) target bundleno = 815 (0x32f), region = 98  ;;  %s2825_s5 = sand.u32 (!%p2771_p0), 1, %s2609_s18  }
  0x4a   : > { %s2072_s6 = sshll.u32 (!%p2771_p0), %s2825_s5, 6  ;;  %s2073_s7 = sshll.u32 (!%p2771_p0), %s2825_s5, 3 }
  0x4b   : > { %s2829_s9 = scalar_lea.vmem (!%p2771_p0), [#allocation2], %s2072_s6  ;;  %s559_s11 = scalar_lea.sflag (!%p2771_p0), [#allocation4], %s2825_s5 }
  0x4c   : > { %s2832_s12 = scalar_lea.vmem (!%p2771_p0), [#allocation3], %s2073_s7 }
  0x4e   : > { %2584 = dma.done.wait (%p2751_p8), %s559_s11, 128  }
  0x4f   : > { %2586 = vsyncadd (%p2751_p8), %s559_s11, 4294967168 }
  0x50   : > { %2588 = dma.done.wait (%p2743_p5), [#allocation7], 4128  }
  0x51   : > { %2590 = vsyncadd (%p2743_p5), [#allocation7], 4294963168 }
  0x52   : > { %2592 = dma.done.wait (%p2743_p5), [#allocation10], 64  }
  0x53   : > { %2594 = vsyncadd (%p2743_p5), [#allocation10], 4294967232 }
  0x54   : > { %2596 = dma.done.wait (%p2743_p5), [#allocation13], 32  }
  0x55   : > { %2598 = vsyncadd (%p2743_p5), [#allocation13], 4294967264  ;;  %v708_v8 = vld [vmem:[#allocation8 + $0xf8] sm:$0xff]  ;;  %v706_v9 = vld [vmem:[#allocation8 + $0xe8] sm:$0xff]  ;;  %p649_p4 = scmp.lt.s32.totalorder %s2617_s20, 1  ;;  %s3729_s24 = sld [smem:[#allocation25_spill]] }
  0x56   : > { %2201 = vmatpush.msra.mxu2 %v708_v8  ;;  %750 = vmatpush.msra.mxu1 %v708_v8  ;;  %v704_v10 = vld [vmem:[#allocation8 + $0xd8] sm:$0xff]  ;;  %v702_v11 = vld [vmem:[#allocation8 + $0xc8] sm:$0xff]  ;;  %v707_v1 = vld [vmem:[#allocation8 + $0xf0] sm:$0xff]  ;;  %s3730_s29 = sld [smem:[#allocation29_spill]]  ;;  %s2635_s27 = smov 64   ;;  %vm1303_vm6 = vcmask 523264  }
  0x57   : > { %v700_v12 = vld [vmem:[#allocation8 + $0xb8] sm:$0xff]  ;;  %v698_v13 = vld [vmem:[#allocation8 + $0xa8] sm:$0xff]  ;;  %s650_s25 = scalar_select %p649_p4, %s2617_s20, 1  ;;  %709 = vmatpush.msra.mxu0 %v707_v1  ;;  %v705_v5 = vld [vmem:[#allocation8 + $0xe0] sm:$0xff] }
  0x58   : > { %2202 = vmatpush.msra.mxu2 %v706_v9  ;;  %751 = vmatpush.msra.mxu1 %v706_v9  ;;  %v696_v14 = vld [vmem:[#allocation8 + $0x98] sm:$0xff]  ;;  %v694_v15 = vld [vmem:[#allocation8 + $0x88] sm:$0xff]  ;;  %v703_v6 = vld [vmem:[#allocation8 + $0xd0] sm:$0xff]  ;;  %s3731_s30 = sld [smem:[#allocation30_spill]]  ;;  %s2079_s1 = sshll.u32 %s2825_s5, 7 }
  0x59   : > { %v692_v16 = vld [vmem:[#allocation8 + $0x78] sm:$0xff]  ;;  %v690_v17 = vld [vmem:[#allocation8 + $0x68] sm:$0xff]  ;;  %s2198_s6 = sshll.u32 %s650_s25, 8  ;;  %710 = vmatpush.msra.mxu0 %v705_v5  ;;  %v701_v7 = vld [vmem:[#allocation8 + $0xc0] sm:$0xff]  ;;  %s2199_s7 = sshll.u32 %s2617_s20, 7 }
  0x5a   : > { %2203 = vmatpush.msra.mxu2 %v704_v10  ;;  %752 = vmatpush.msra.mxu1 %v704_v10  ;;  %v688_v18 = vld [vmem:[#allocation8 + $0x58] sm:$0xff]  ;;  %v686_v19 = vld [vmem:[#allocation8 + $0x48] sm:$0xff]  ;;  %v699_v10 = vld [vmem:[#allocation8 + $0xb0] sm:$0xff]  ;;  %s1861_s20 = scalar_lea.sflag [#allocation5], %s2825_s5 }
  0x5b   : > { %v684_v20 = vld [vmem:[#allocation8 + $0x38] sm:$0xff]  ;;  %v682_v21 = vld [vmem:[#allocation8 + $0x28] sm:$0xff]  ;;  %s657_s15 = scalar_lea.vmem %s3729_s24, %s2198_s6  ;;  %711 = vmatpush.msra.mxu0 %v703_v6  ;;  %s3615_s6 = scalar_lea.vmem [#allocation14], %s2079_s1 }
  0x5c   : > { %2204 = vmatpush.msra.mxu2 %v702_v11  ;;  %753 = vmatpush.msra.mxu1 %v702_v11  ;;  %v680_v22 = vld [vmem:[#allocation8 + $0x18] sm:$0xff]  ;;  %v678_v23 = vld [vmem:[#allocation8 + $0x8] sm:$0xff]  ;;  %v697_v11 = vld [vmem:[#allocation8 + $0xa0] sm:$0xff]  ;;  %s1876_s13 = sshll.u32 %s3615_s6, 4  ;;  %s1877_s13 = int_to_ptr.vmem [resolvable:$true] %s1876_s13 }
  0x5d   : > { %v2851_v24 = vld [vmem:[%s2829_s9 + $0x20] sm:$0xff]  ;;  %v840_v25 = vld [vmem:[%s3691_s4 + $0x78] sm:$0xff]  ;;  %v839_v26 = vld [vmem:[%s3691_s4 + $0x70] sm:$0xff]  ;;  %712 = vmatpush.msra.mxu0 %v701_v7 }
  0x5e   : > { %2205 = vmatpush.msra.mxu2 %v700_v12  ;;  %754 = vmatpush.msra.mxu1 %v700_v12  ;;  %v2861_v27 = vld [vmem:[%s2829_s9] sm:$0xff]  ;;  %v838_v28 = vld [vmem:[%s3691_s4 + $0x68] sm:$0xff]  ;;  %v836_v31 = vld [vmem:[%s3691_s4 + $0x58] sm:$0xff] }
  0x5f   : > { %v837_v29 = vld [vmem:[%s3691_s4 + $0x60] sm:$0xff]  ;;  %v2872_v30 = vld [vmem:[%s2829_s9 + $0x28] sm:$0xff]  ;;  %v835_v32 = vld [vmem:[%s3691_s4 + $0x50] sm:$0xff]  ;;  %713 = vmatpush.msra.mxu0 %v699_v10 }
  0x60   : > { %2206 = vmatpush.msra.mxu2 %v698_v13  ;;  %755 = vmatpush.msra.mxu1 %v698_v13  ;;  %v2883_v33 = vld [vmem:[%s2829_s9 + $0x8] sm:$0xff]  ;;  %v833_v35 = vld [vmem:[%s3691_s4 + $0x40] sm:$0xff]  ;;  %v2893_v36 = vld [vmem:[%s2829_s9 + $0x30] sm:$0xff] }
  0x61   : > { %v834_v34 = vld [vmem:[%s3691_s4 + $0x48] sm:$0xff]  ;;  %v832_v37 = vld [vmem:[%s3691_s4 + $0x38] sm:$0xff]  ;;  %v831_v38 = vld [vmem:[%s3691_s4 + $0x30] sm:$0xff]  ;;  %714 = vmatpush.msra.mxu0 %v697_v11 }
  0x62   : > { %2207 = vmatpush.msra.mxu2 %v696_v14  ;;  %756 = vmatpush.msra.mxu1 %v696_v14  ;;  %v2905_v39 = vld [vmem:[#allocation6] ss:$0 sm:$0xff]  ;;  %v675_v41 = vld [vmem:[%s657_s15] sm:$0xff]  ;;  %v830_v42 = vld [vmem:[%s3691_s4 + $0x28] sm:$0xff] }
  0x63   : > { %v2908_v40 = vld [vmem:[%s2829_s9 + $0x10] sm:$0xff]  ;;  %v829_v43 = vld [vmem:[%s3691_s4 + $0x20] sm:$0xff]  ;;  %v794_v44 = vmul.f32 %v2905_v39, %v675_v41  ;;  %v2921_v46 = vld [vmem:[%s2829_s9 + $0x38] sm:$0xff]  ;;  %v795_v54 = vmul.f32 %v2905_v39, %v2861_v27  ;;  %v796_v57 = vmul.f32 %v2905_v39, %v2883_v33  ;;  %v799_v3 = vmul.f32 %v2905_v39, %v2851_v24 }
  0x64   : > { %2208 = vmatpush.msra.mxu2 %v694_v15  ;;  %757 = vmatpush.msra.mxu1 %v694_v15  ;;  %v2918_v45 = vld [vmem:[#allocation6 + $0x1] ss:$0 sm:$0xff]  ;;  %v828_v47 = vld [vmem:[%s3691_s4 + $0x18] sm:$0xff]  ;;  %v826_v51 = vld [vmem:[%s3691_s4 + $0x8] sm:$0xff]  ;;  %v797_v60 = vmul.f32 %v2905_v39, %v2908_v40  ;;  %v800_v9 = vmul.f32 %v2905_v39, %v2872_v30 }
  0x65   : > { %v827_v48 = vld [vmem:[%s3691_s4 + $0x10] sm:$0xff]  ;;  %v805_v49 = vadd.f32 %v2918_v45, %v794_v44  ;;  %v2932_v50 = vld [vmem:[%s2829_s9 + $0x18] sm:$0xff]  ;;  %v825_v52 = vld [vmem:[%s3691_s4] sm:$0xff]  ;;  %v806_v55 = vadd.f32 %v2918_v45, %v795_v54  ;;  %v807_v58 = vadd.f32 %v2918_v45, %v796_v57  ;;  %v810_v4 = vadd.f32 %v2918_v45, %v799_v3  ;;  %s3732_s9 = sld [smem:[#allocation31_spill]] }
  0x66   : > { %2209 = vmatpush.msra.mxu2 %v692_v16  ;;  %758 = vmatpush.msra.mxu1 %v692_v16  ;;  %v808_v61 = vadd.f32 %v2918_v45, %v797_v60  ;;  %v798_v63 = vmul.f32 %v2905_v39, %v2932_v50  ;;  %v811_v12 = vadd.f32 %v2918_v45, %v800_v9  ;;  %v695_v13 = vld [vmem:[#allocation8 + $0x90] sm:$0xff]  ;;  %v693_v14 = vld [vmem:[#allocation8 + $0x80] sm:$0xff]  ;;  %v2634_v57 = vmov 0.0  }
  0x67   : > { %v815_v53 = vmax.f32 %v805_v49, 0.0  ;;  %v816_v56 = vmax.f32 %v806_v55, 0.0  ;;  %v817_v59 = vmax.f32 %v807_v58, 0.0  ;;  %v820_v8 = vmax.f32 %v810_v4, 0.0  ;;  %715 = vmatpush.msra.mxu0 %v695_v13  ;;  %v2119_v41 = vld [vmem:[%s3730_s29 + $0x148] sm:$0xff] }
  0x68   : > { %2210 = vmatpush.msra.mxu2 %v690_v17  ;;  %759 = vmatpush.msra.mxu1 %v690_v17  ;;  %v818_v62 = vmax.f32 %v808_v61, 0.0  ;;  %v809_v0 = vadd.f32 %v2918_v45, %v798_v63  ;;  %v821_v15 = vmax.f32 %v811_v12, 0.0  ;;  %v801_v16 = vmul.f32 %v2905_v39, %v2893_v36  ;;  %v691_v17 = vld [vmem:[#allocation8 + $0x70] sm:$0xff]  ;;  %v3010_v49 = vld [vmem:[#allocation9 + $0x1] ss:$0 sm:$0xff] }
  0x69   : > { %716 = vmatpush.msra.mxu0 %v693_v14  ;;  %v3017_v58 = vrot.slane %v2634_v57, 7 }
  0x6a   : > { %2211 = vmatpush.msra.mxu2 %v688_v18  ;;  %760 = vmatpush.msra.mxu1 %v688_v18  ;;  %v819_v2 = vmax.f32 %v809_v0, 0.0  ;;  %v689_v18 = vld [vmem:[#allocation8 + $0x60] sm:$0xff] }
  0x6b   : > { %717 = vmatpush.msra.mxu0 %v691_v17  ;;  %s1875_s24 = scalar_lea.hbm %s3732_s9, %s2199_s7  ;;  %s2551_s23 = scalar_lea.hbm %s3732_s9, 256 }
  0x6c   : > { %2212 = vmatpush.msra.mxu2 %v686_v19  ;;  %761 = vmatpush.msra.mxu1 %v686_v19  ;;  %v812_v19 = vadd.f32 %v2918_v45, %v801_v16  ;;  %s1878_s26 = sshll.u32 %s1875_s24, 4  ;;  %s1879_s26 = int_to_ptr.hbm [resolvable:$true] %s1878_s26 }
  0x6d   : > { %718 = vmatpush.msra.mxu0 %v689_v18  ;;  %s2545_s16 = sshra.s32 %s1879_s26, 4  ;;  %s2546_s16 = int_to_ptr.hbm [resolvable:$true] %s2545_s16 }
  0x6e   : > { %2213 = vmatpush.msra.mxu2 %v684_v20  ;;  %762 = vmatpush.msra.mxu1 %v684_v20  ;;  %v687_v20 = vld [vmem:[#allocation8 + $0x50] sm:$0xff]  ;;  %s2547_s14 = scalar_lea.hbm %s2546_s16, 128  ;;  %p2552_p8 = scmp.lt.s32.totalorder %s2546_s16, %s3732_s9 }
  0x6f   : > { %719 = vmatpush.msra.mxu0 %v687_v20  ;;  %p2548_p5 = scmp.ne.s32.totalorder %s2546_s16, %s2547_s14  ;;  %p2553_p10 = scmp.lt.s32.totalorder %s2551_s23, %s2547_s14 }
  0x70   : > { %2214 = vmatpush.msra.mxu2 %v682_v21  ;;  %763 = vmatpush.msra.mxu1 %v682_v21  ;;  %v685_v21 = vld [vmem:[#allocation8 + $0x40] sm:$0xff] }
  0x71   : > { %720 = vmatpush.msra.mxu0 %v685_v21  ;;  %p2549_p6 = pnand %p2548_p5, %p2755_p9  ;;  %p2554_p12 = por %p2553_p10, %p2552_p8 }
  0x72   : > { %2215 = vmatpush.msra.mxu2 %v680_v22  ;;  %764 = vmatpush.msra.mxu1 %v680_v22  ;;  %v822_v22 = vmax.f32 %v812_v19, 0.0 }
  0x73   : > { %p2550_p7 = pneg %p2549_p6 }
  0x74   : > { %2216 = vmatpush.msra.mxu2 %v678_v23  ;;  %765 = vmatpush.msra.mxu1 %v678_v23  ;;  %v802_v23 = vmul.f32 %v2905_v39, %v2921_v46 }
  0x75   : > { %778 = vmatmul.f32.vlgmr.msra.gmra.mxu2 %v2851_v24  ;;  %766 = vmatmul.f32.vlgmr.msra.gmra.mxu1 %v2861_v27  ;;  %p2555_p13 = pnand %p2554_p12, %p2550_p7 }
  0x76   : > { %841 = vmatpush.msrb.mxu2 %v840_v25  ;;  %v683_v25 = vld [vmem:[#allocation8 + $0x30] sm:$0xff] }
  0x77   : > { %721 = vmatpush.msra.mxu0 %v683_v25 }
  0x78   : > { %842 = vmatpush.msrb.mxu2 %v839_v26  ;;  %v681_v26 = vld [vmem:[#allocation8 + $0x20] sm:$0xff] }
  0x79   : > { %722 = vmatpush.msra.mxu0 %v681_v26 }
  0x7a   : > { %843 = vmatpush.msrb.mxu2 %v838_v28  ;;  %v813_v28 = vadd.f32 %v2918_v45, %v802_v23 }
  0x7c   : > { %844 = vmatpush.msrb.mxu2 %v837_v29  ;;  %v679_v29 = vld [vmem:[#allocation8 + $0x10] sm:$0xff] }
  0x7d   : > { %781 = vmatmul.f32.gmra.mxu2 %v2872_v30  ;;  %769 = vmatmul.f32.gmra.mxu1 %v2883_v33 }
  0x7e   : > { %845 = vmatpush.msrb.mxu2 %v836_v31  ;;  %v677_v31 = vld [vmem:[#allocation8] sm:$0xff]  ;;  %723 = vmatpush.msra.mxu0 %v679_v29 }
  0x80   : > { %846 = vmatpush.msrb.mxu2 %v835_v32  ;;  %v823_v32 = vmax.f32 %v813_v28, 0.0  ;;  %724 = vmatpush.msra.mxu0 %v677_v31 }
  0x81   : > { %725 = vmatmul.f32.vlgmr.msra.gmra.mxu0 %v2861_v27  ;;  %v2125_v27 = vld [vmem:[%s3730_s29 + $0x178] sm:$0xff] }
  0x82   : > { %847 = vmatpush.msrb.mxu2 %v834_v34  ;;  %1436 = vmatpush.msrb.mxu0 %v2125_v27 }
  0x84   : > { %848 = vmatpush.msrb.mxu2 %v833_v35 }
  0x85   : > { %784 = vmatmul.f32.gmra.mxu2 %v2893_v36  ;;  %772 = vmatmul.f32.gmra.mxu1 %v2908_v40 }
  0x86   : > { %849 = vmatpush.msrb.mxu2 %v832_v37 }
  0x88   : > { %850 = vmatpush.msrb.mxu2 %v831_v38  ;;  %v2120_v38 = vld [vmem:[%s3730_s29 + $0x150] sm:$0xff] }
  0x89   : > { %728 = vmatmul.f32.gmra.mxu0 %v2883_v33  ;;  %v2124_v33 = vld [vmem:[%s3730_s29 + $0x170] sm:$0xff] }
  0x8a   : > { %851 = vmatpush.msrb.mxu2 %v830_v42  ;;  %1437 = vmatpush.msrb.mxu0 %v2124_v33  ;;  %v2118_v42 = vld [vmem:[%s3730_s29 + $0x140] sm:$0xff] }
  0x8c   : > { %852 = vmatpush.msrb.mxu2 %v829_v43  ;;  %v922_v43 = vlaneseq }
  0x8d   : > { %787 = vmatmul.f32.gmra.mxu2 %v2921_v46  ;;  %775 = vmatmul.f32.gmra.mxu1 %v2932_v50 }
  0x8e   : > { %853 = vmatpush.msrb.mxu2 %v828_v47 }
  0x90   : > { %854 = vmatpush.msrb.mxu2 %v827_v48  ;;  %v3008_v48 = vld [vmem:[#allocation9] ss:$0 sm:$0xff] }
  0x91   : > { %731 = vmatmul.f32.gmra.mxu0 %v2908_v40 }
  0x92   : > { %855 = vmatpush.msrb.mxu2 %v826_v51 }
  0x94   : > { %856 = vmatpush.msrb.mxu2 %v825_v52 }
  0x95   : > { %857 = vmatmul.f32.vlgmr.msrb.gmra.mxu2 %v815_v53 }
  0x99   : > { %734 = vmatmul.f32.gmra.mxu0 %v2932_v50 }
  0x9d   : > { %860 = vmatmul.f32.gmra.mxu2 %v816_v56 }
  0xa1   : > { %737 = vmatmul.f32.gmra.mxu0 %v2851_v24  ;;  %v2123_v24 = vld [vmem:[%s3730_s29 + $0x168] sm:$0xff] }
  0xa2   : > { %1438 = vmatpush.msrb.mxu0 %v2123_v24 }
  0xa5   : > { %863 = vmatmul.f32.gmra.mxu2 %v817_v59  ;;  %v3022_v59 = vrot.slane %v2634_v57, 1 }
  0xa9   : > { %740 = vmatmul.f32.gmra.mxu0 %v2872_v30  ;;  %v2122_v30 = vld [vmem:[%s3730_s29 + $0x160] sm:$0xff] }
  0xaa   : > { %1439 = vmatpush.msrb.mxu0 %v2122_v30 }
  0xad   : > { %866 = vmatmul.f32.gmra.mxu2 %v818_v62 }
  0xb1   : > { %743 = vmatmul.f32.gmra.mxu0 %v2893_v36  ;;  %v2121_v36 = vld [vmem:[%s3730_s29 + $0x158] sm:$0xff] }
  0xb2   : > { %1440 = vmatpush.msrb.mxu0 %v2121_v36 }
  0xb4   : > { %1441 = vmatpush.msrb.mxu0 %v2120_v38 }
  0xb5   : > { %869 = vmatmul.f32.gmra.mxu2 %v819_v2 }
  0xb6   : > { %1442 = vmatpush.msrb.mxu0 %v2119_v41 }
  0xb8   : > { %1443 = vmatpush.msrb.mxu0 %v2118_v42 }
  0xb9   : > { %746 = vmatmul.f32.gmra.mxu0 %v2921_v46  ;;  %v3005_v46 = vshrl.u32 %v922_v43, 7 }
  0xbb   : > { %v924_v47 = vadd.s32 8, %v3005_v46  ;;  %v1025_v53 = vand.u32 7, %v3005_v46  ;;  %v925_v55 = vadd.s32 16, %v3005_v46  ;;  %vm1211_vm2 = vcmp.lt.s32.totalorder %v3005_v46, 1 }
  0xbc   : > { %vm1242_vm3 = vcmp.lt.s32.totalorder %v3005_v46, 7  ;;  %v928_v41 = vadd.s32 40, %v3005_v46 }
  0xbd   : > { %872 = vmatmul.f32.gmra.mxu2 %v820_v8  ;;  %v1032_v51 = vand.u32 7, %v924_v47  ;;  %vm1171_vm1 = vcmp.lt.s32.totalorder %v1025_v53, 7  ;;  %v1039_v0 = vand.u32 7, %v925_v55  ;;  %v926_v8 = vadd.s32 24, %v3005_v46 }
  0xbe   : > { %v2092_v1 = vsel %vm1171_vm1, 1.0, %v2634_v57 }
  0xbf   : > { %vm1142_vm0 = vcmp.gt.s32.totalorder %v1032_v51, 0  ;;  %vm1172_vm4 = vcmp.lt.s32.totalorder %v1032_v51, 7  ;;  %vm1143_vm5 = vcmp.gt.s32.totalorder %v1039_v0, 0  ;;  %vm1173_vm7 = vcmp.lt.s32.totalorder %v1039_v0, 7  ;;  %v3093_v0 = vld [vmem:[%s3730_s29 + $0x238] sm:$0xff] }
  0xc0   : > { %v2083_v62 = vsel %vm1142_vm0, 1.0, %v2634_v57  ;;  %v2093_v12 = vsel %vm1172_vm4, 1.0, %v2634_v57  ;;  %v2084_v13 = vsel %vm1143_vm5, 1.0, %v2634_v57  ;;  %v2094_v28 = vsel %vm1173_vm7, 1.0, %v2634_v57  ;;  %1631 = vmatpush.msra.mxu0 %v3093_v0 }
  0xc5   : > { %875 = vmatmul.f32.gmra.mxu2 %v821_v15  ;;  %v1046_v15 = vand.u32 7, %v926_v8 }
  0xc7   : > { %vm1144_vm8 = vcmp.gt.s32.totalorder %v1046_v15, 0  ;;  %vm1174_vm9 = vcmp.lt.s32.totalorder %v1046_v15, 7 }
  0xc8   : > { %v2085_v29 = vsel %vm1144_vm8, 1.0, %v2634_v57  ;;  %v2095_v47 = vsel %vm1174_vm9, 1.0, %v2634_v57 }
  0xcd   : > { %878 = vmatmul.f32.gmra.mxu2 %v822_v22  ;;  %v927_v22 = vadd.s32 32, %v3005_v46 }
  0xd5   : > { %881 = vmatmul.f32.gmra.mxu2 %v823_v32  ;;  %v1053_v32 = vand.u32 7, %v927_v22  ;;  %v3133_v22 = vld [vmem:[%s3730_s29 + $0x218] sm:$0xff] }
  0xd7   : > { %vm1145_vm10 = vcmp.gt.s32.totalorder %v1053_v32, 0  ;;  %vm1175_vm11 = vcmp.lt.s32.totalorder %v1053_v32, 7 }
  0xd8   : > { %v2096_v8 = vsel %vm1175_vm11, 1.0, %v2634_v57 }
  0xf8   : > { %v2970_v34 = vpop.f32.mrf.mxu2 }
 0x100   : > { %v2973_v35 = vpop.f32.mrf.mxu2 }
 0x108   : > { %v2982_v37 = vpop.f32.mrf.mxu2 }
 0x110   : > { %v2997_v40 = vpop.f32.mrf.mxu2 }
 0x118   : > { %v858_v44 = vpop.f32.mrf.mxu2 }
 0x120   : > { %v861_v50 = vpop.f32.mrf.mxu2 }
 0x121   : > { %v892_v52 = vmul.f32 %v3008_v48, %v861_v50  ;;  %v2086_v50 = vsel %vm1145_vm10, 1.0, %v2634_v57 }
 0x123   : > { %v903_v54 = vadd.f32 %v3010_v49, %v892_v52  ;;  %v1060_v52 = vand.u32 7, %v928_v41 }
 0x125   : > { %v913_v56 = vmax.f32 %v903_v54, 0.0  ;;  %vm1146_vm12 = vcmp.gt.s32.totalorder %v1060_v52, 0  ;;  %vm1176_vm13 = vcmp.lt.s32.totalorder %v1060_v52, 7  ;;  %v3174_v52 = vadd.s32 72, %v3005_v46 }
 0x127   : > { %v1202_v60 = vrot.slane %v913_v56, 7  ;;  %v1233_v61 = vrot.slane %v913_v56, 1  ;;  %1275 = vrot.lane.b32.xlu0 %v913_v56, %s2635_s27 }
 0x128   : > { %v864_v63 = vpop.f32.mrf.mxu2 }
 0x129   : > { %v893_v2 = vmul.f32 %v3008_v48, %v864_v63  ;;  %v1220_v3 = vsel %vm1211_vm2, %v3017_v58, %v1202_v60  ;;  %v1251_v5 = vsel %vm1242_vm3, %v3022_v59, %v1233_v61  ;;  %v929_v63 = vadd.s32 48, %v3005_v46 }
 0x12a   : > { %v3033_v4 = vmul.f32 %v2083_v62, %v1220_v3  ;;  %v3039_v7 = vmul.f32 %v2092_v1, %v1251_v5  ;;  %v3098_v1 = vld [vmem:[%s3730_s29 + $0x230] sm:$0xff]  ;;  %v3104_v3 = vld [vmem:[%s3730_s29 + $0x228] sm:$0xff] }
 0x12b   : > { %v904_v6 = vadd.f32 %v3010_v49, %v893_v2  ;;  %1632 = vmatpush.msra.mxu0 %v3098_v1 }
 0x12d   : > { %v914_v9 = vmax.f32 %v904_v6, 0.0  ;;  %1633 = vmatpush.msra.mxu0 %v3104_v3 }
 0x12f   : > { %v1203_v10 = vrot.slane %v914_v9, 7  ;;  %v1234_v11 = vrot.slane %v914_v9, 1  ;;  %1277 = vrot.lane.b32.xlu0 %v914_v9, %s2635_s27  ;;  %v2087_v9 = vsel %vm1146_vm12, 1.0, %v2634_v57 }
 0x130   : > { %v867_v14 = vpop.f32.mrf.mxu2 }
 0x131   : > { %v894_v16 = vmul.f32 %v3008_v48, %v867_v14  ;;  %v1250_v17 = vsel %vm1242_vm3, %v1233_v61, %v1234_v11  ;;  %v1219_v18 = vsel %vm1211_vm2, %v1202_v60, %v1203_v10 }
 0x132   : > { %v3050_v19 = vmul.f32 %v2093_v12, %v1250_v17  ;;  %v3052_v20 = vmul.f32 %v2084_v13, %v1219_v18  ;;  %v3113_v12 = vld [vmem:[%s3730_s29 + $0x220] sm:$0xff] }
 0x133   : > { %v905_v21 = vadd.f32 %v3010_v49, %v894_v16  ;;  %1634 = vmatpush.msra.mxu0 %v3113_v12 }
 0x134   : > { %2126 = vmatmul.msk.f32.vlgmr.msrb.gmra.mxu0 %vm1303_vm6, %v3050_v19 }
 0x135   : > { %v915_v23 = vmax.f32 %v905_v21, 0.0  ;;  %v930_v21 = vadd.s32 56, %v3005_v46  ;;  %1635 = vmatpush.msra.mxu0 %v3133_v22 }
 0x137   : > { %v1204_v25 = vrot.slane %v915_v23, 7  ;;  %v1235_v26 = vrot.slane %v915_v23, 1  ;;  %1279 = vrot.lane.b32.xlu1 %v915_v23, %s2635_s27  ;;  %v3138_v23 = vld [vmem:[%s3730_s29 + $0x210] sm:$0xff] }
 0x138   : > { %v870_v31 = vpop.f32.mrf.mxu2  ;;  %1636 = vmatpush.msra.mxu0 %v3138_v23 }
 0x139   : > { %v895_v27 = vmul.f32 %v3008_v48, %v870_v31  ;;  %v1249_v33 = vsel %vm1242_vm3, %v1234_v11, %v1235_v26  ;;  %v1218_v24 = vsel %vm1211_vm2, %v1203_v10, %v1204_v25  ;;  %v1067_v11 = vand.u32 7, %v929_v63 }
 0x13a   : > { %v3066_v30 = vmul.f32 %v2094_v28, %v1249_v33  ;;  %v3068_v36 = vmul.f32 %v2085_v29, %v1218_v24  ;;  %v2097_v31 = vsel %vm1176_vm13, 1.0, %v2634_v57  ;;  %v1074_v33 = vand.u32 7, %v930_v21  ;;  %v3153_v24 = vld [vmem:[%s3730_s29 + $0x200] sm:$0xff] }
 0x13b   : > { %v906_v38 = vadd.f32 %v3010_v49, %v895_v27  ;;  %vm1147_vm14 = vcmp.gt.s32.totalorder %v1067_v11, 0  ;;  %vm1177_vm15 = vcmp.lt.s32.totalorder %v1067_v11, 7 }
 0x13c   : > { %2127 = vmatmul.msk.f32.gmra.mxu0 %vm1303_vm6, %v3066_v30  ;;  %v2088_v32 = vsel %vm1147_vm14, 1.0, %v2634_v57  ;;  %vm1148_vm0 = vcmp.gt.s32.totalorder %v1074_v33, 0  ;;  %vm1178_vm1 = vcmp.lt.s32.totalorder %v1074_v33, 7  ;;  %v2113_v33 = vld [vmem:[%s3730_s29 + $0x118] sm:$0xff] }
 0x13d   : > { %v916_v42 = vmax.f32 %v906_v38, 0.0  ;;  %v2089_v63 = vsel %vm1148_vm0, 1.0, %v2634_v57  ;;  %v2099_v21 = vsel %vm1178_vm1, 1.0, %v2634_v57 }
 0x13f   : > { %v1205_v43 = vrot.slane %v916_v42, 7  ;;  %v1236_v44 = vrot.slane %v916_v42, 1  ;;  %1281 = vrot.lane.b32.xlu1 %v916_v42, %s2635_s27 }
 0x140   : > { %v873_v51 = vpop.f32.mrf.mxu2 }
 0x141   : > { %v896_v54 = vmul.f32 %v3008_v48, %v873_v51  ;;  %v1248_v55 = vsel %vm1242_vm3, %v1235_v26, %v1236_v44  ;;  %v1217_v56 = vsel %vm1211_vm2, %v1204_v25, %v1205_v43  ;;  %v3144_v26 = vld [vmem:[%s3730_s29 + $0x208] sm:$0xff]  ;;  %v2117_v51 = vld [vmem:[%s3730_s29 + $0x138] sm:$0xff] }
 0x142   : > { %v3082_v60 = vmul.f32 %v2095_v47, %v1248_v55  ;;  %v3084_v61 = vmul.f32 %v2086_v50, %v1217_v56  ;;  %1637 = vmatpush.msra.mxu0 %v3144_v26  ;;  %v931_v50 = vadd.s32 64, %v3005_v46  ;;  %1387 = vmatpush.msra.mxu3 %v2117_v51  ;;  %v2112_v51 = vld [vmem:[%s3730_s29 + $0x110] sm:$0xff]  ;;  %v3422_v46 = vpop.f32.mrf.mxu0 }
 0x143   : > { %v907_v62 = vadd.f32 %v3010_v49, %v896_v54 }
 0x144   : > { %2128 = vmatmul.msk.f32.gmra.mxu0 %vm1303_vm6, %v3082_v60 }
 0x145   : > { %v917_v2 = vmax.f32 %v907_v62, 0.0  ;;  %1638 = vmatpush.msra.mxu0 %v3153_v24  ;;  %v2098_v62 = vsel %vm1177_vm15, 1.0, %v2634_v57 }
 0x147   : > { %v1206_v5 = vrot.slane %v917_v2, 7  ;;  %v1237_v6 = vrot.slane %v917_v2, 1  ;;  %1283 = vrot.lane.b32.xlu2 %v917_v2, %s2635_s27 }
 0x148   : > { %v876_v10 = vpop.f32.mrf.mxu2 }
 0x149   : > { %v897_v13 = vmul.f32 %v3008_v48, %v876_v10  ;;  %v1247_v14 = vsel %vm1242_vm3, %v1236_v44, %v1237_v6  ;;  %v1216_v15 = vsel %vm1211_vm2, %v1205_v43, %v1206_v5 }
 0x14a   : > { %v3121_v16 = vmul.f32 %v2096_v8, %v1247_v14  ;;  %v3123_v17 = vmul.f32 %v2087_v9, %v1216_v15 }
 0x14b   : > { %v908_v18 = vadd.f32 %v3010_v49, %v897_v13 }
 0x14c   : > { %2129 = vmatmul.msk.f32.gmra.mxu0 %vm1303_vm6, %v3121_v16 }
 0x14d   : > { %v918_v25 = vmax.f32 %v908_v18, 0.0  ;;  %v2115_v18 = vld [vmem:[%s3730_s29 + $0x128] sm:$0xff] }
 0x14f   : > { %v1207_v28 = vrot.slane %v918_v25, 7  ;;  %v1238_v29 = vrot.slane %v918_v25, 1  ;;  %1285 = vrot.lane.b32.xlu2 %v918_v25, %s2635_s27 }
 0x150   : > { %v879_v27 = vpop.f32.mrf.mxu2 }
 0x151   : > { %v898_v38 = vmul.f32 %v3008_v48, %v879_v27  ;;  %v1246_v41 = vsel %vm1242_vm3, %v1237_v6, %v1238_v29  ;;  %v1215_v42 = vsel %vm1211_vm2, %v1206_v5, %v1207_v28  ;;  %v1081_v5 = vand.u32 7, %v931_v50 }
 0x152   : > { %v3161_v43 = vmul.f32 %v2097_v31, %v1246_v41  ;;  %v3163_v44 = vmul.f32 %v2088_v32, %v1215_v42  ;;  %v1088_v6 = vand.u32 7, %v3174_v52  ;;  %v1715_v52 = vld [vmem:[%s3731_s30 + $0x78] sm:$0xff] }
 0x153   : > { %v909_v47 = vadd.f32 %v3010_v49, %v898_v38  ;;  %vm1149_vm4 = vcmp.gt.s32.totalorder %v1081_v5, 0  ;;  %vm1179_vm7 = vcmp.lt.s32.totalorder %v1081_v5, 7  ;;  %v2110_v5 = vld [vmem:[%s3730_s29 + $0x100] sm:$0xff] }
 0x154   : > { %2130 = vmatmul.msk.f32.gmra.mxu0 %vm1303_vm6, %v3161_v43  ;;  %vm1150_vm5 = vcmp.gt.s32.totalorder %v1088_v6, 0  ;;  %v2090_v31 = vsel %vm1149_vm4, 1.0, %v2634_v57 }
 0x155   : > { %v919_v54 = vmax.f32 %v909_v47, 0.0  ;;  %v2091_v32 = vsel %vm1150_vm5, 1.0, %v2634_v57 }
 0x157   : > { %v1208_v55 = vrot.slane %v919_v54, 7  ;;  %v1239_v56 = vrot.slane %v919_v54, 1  ;;  %1273 = vrot.lane.b32.xlu2 %v2634_v57, %s2635_s27  ;;  %1287 = vrot.lane.b32.xlu0 %v919_v54, %s2635_s27  ;;  %v2156_v54 = vld [vmem:[%s3730_s29 + $0x1f0] sm:$0xff] }
 0x158   : > { %v882_v2 = vpop.f32.mrf.mxu2 }
 0x159   : > { %v899_v8 = vmul.f32 %v3008_v48, %v882_v2  ;;  %v1245_v9 = vsel %vm1242_vm3, %v1238_v29, %v1239_v56  ;;  %v1214_v10 = vsel %vm1211_vm2, %v1207_v28, %v1208_v55  ;;  %v2116_v48 = vld [vmem:[%s3730_s29 + $0x130] sm:$0xff]  ;;  %v2114_v29 = vld [vmem:[%s3730_s29 + $0x120] sm:$0xff] }
 0x15a   : > { %v3187_v11 = vmul.f32 %v2098_v62, %v1245_v9  ;;  %v3189_v13 = vmul.f32 %v2089_v63, %v1214_v10  ;;  %1388 = vmatpush.msra.mxu3 %v2116_v48  ;;  %v2154_v62 = vld [vmem:[%s3730_s29 + $0x1e0] sm:$0xff]  ;;  %v2100_v63 = vsel %vm1179_vm7, 1.0, %v2634_v57  ;;  %v2109_v9 = vld [vmem:[%s3730_s29 + $0xf8] sm:$0xff]  ;;  %v2152_v48 = vld [vmem:[%s3730_s29 + $0x1d0] sm:$0xff] }
 0x15b   : > { %v910_v14 = vadd.f32 %v3010_v49, %v899_v8  ;;  %v2157_v49 = vld [vmem:[%s3730_s29 + $0x1f8] sm:$0xff] }
 0x15c   : > { %2131 = vmatmul.msk.f32.gmra.mxu0 %vm1303_vm6, %v3187_v11  ;;  %1582 = vmatpush.msra.mxu2 %v2157_v49  ;;  %v2153_v8 = vld [vmem:[%s3730_s29 + $0x1d8] sm:$0xff]  ;;  %v2150_v49 = vld [vmem:[%s3730_s29 + $0x1c0] sm:$0xff] }
 0x15d   : > { %v920_v15 = vmax.f32 %v910_v14, 0.0  ;;  %1389 = vmatpush.msra.mxu3 %v2115_v18  ;;  %v2108_v14 = vld [vmem:[%s3730_s29 + $0xf0] sm:$0xff]  ;;  %v2151_v18 = vld [vmem:[%s3730_s29 + $0x1c8] sm:$0xff] }
 0x15e   : > { %1583 = vmatpush.msra.mxu2 %v2156_v54 }
 0x15f   : > { %v1209_v25 = vrot.slane %v920_v15, 7  ;;  %v1240_v28 = vrot.slane %v920_v15, 1  ;;  %1291 = vrot.lane.b32.xlu0 %v2634_v57, %s2635_s27  ;;  %1289 = vrot.lane.b32.xlu1 %v920_v15, %s2635_s27  ;;  %v2107_v15 = vld [vmem:[%s3730_s29 + $0xe8] sm:$0xff] }
 0x160   : > { %1390 = vmatpush.msra.mxu3 %v2114_v29  ;;  %v2105_v29 = vld [vmem:[%s3730_s29 + $0xd8] sm:$0xff] }
 0x161   : > { %v1244_v27 = vsel %vm1242_vm3, %v1239_v56, %v1240_v28  ;;  %v1213_v38 = vsel %vm1211_vm2, %v1208_v55, %v1209_v25  ;;  %v1212_v41 = vsel %vm1211_vm2, %v1209_v25, %v3017_v58  ;;  %v2111_v55 = vld [vmem:[%s3730_s29 + $0x108] sm:$0xff]  ;;  %v1243_v2 = vsel %vm1242_vm3, %v1240_v28, %v3022_v59  ;;  %v2106_v25 = vld [vmem:[%s3730_s29 + $0xe0] sm:$0xff]  ;;  %v2149_v28 = vld [vmem:[%s3730_s29 + $0x1b8] sm:$0xff] }
 0x162   : > { %v3224_v42 = vmul.f32 %v2099_v21, %v1244_v27  ;;  %v3226_v47 = vmul.f32 %v2090_v31, %v1213_v38  ;;  %v3228_v50 = vmul.f32 %v2091_v32, %v1212_v41  ;;  %1391 = vmatpush.msra.mxu3 %v2113_v33  ;;  %v2155_v56 = vld [vmem:[%s3730_s29 + $0x1e8] sm:$0xff]  ;;  %v3260_v10 = vmul.f32 %v2100_v63, %v1243_v2  ;;  %v1329_v21 = vld [vmem:[%s3730_s29 + $0x78] sm:$0xff]  ;;  %v2104_v31 = vld [vmem:[%s3730_s29 + $0xd0] sm:$0xff] }
 0x163   : > { %1584 = vmatpush.msra.mxu2 %v2155_v56  ;;  %1472 = vmatpush.msrb.mxu1 %v1329_v21  ;;  %v1328_v32 = vld [vmem:[%s3730_s29 + $0x70] sm:$0xff]  ;;  %v2103_v33 = vld [vmem:[%s3730_s29 + $0xc8] sm:$0xff]  ;;  %v1326_v56 = vld [vmem:[%s3730_s29 + $0x60] sm:$0xff]  ;;  %vm1141_vm2 = vcmp.gt.s32.totalorder %v1025_v53, 0  ;;  %vm1180_vm3 = vcmp.lt.s32.totalorder %v1088_v6, 7 }
 0x164   : > { %2132 = vmatmul.msk.f32.gmra.mxu0 %vm1303_vm6, %v3224_v42  ;;  %1392 = vmatpush.msra.mxu3 %v2112_v51  ;;  %v2148_v27 = vld [vmem:[%s3730_s29 + $0x1b0] sm:$0xff]  ;;  %v1327_v38 = vld [vmem:[%s3730_s29 + $0x68] sm:$0xff]  ;;  %v1321_v21 = vld [vmem:[%s3730_s29 + $0x38] sm:$0xff] }
 0x165   : > { %1585 = vmatpush.msra.mxu2 %v2154_v62  ;;  %1473 = vmatpush.msrb.mxu1 %v1328_v32  ;;  %v2147_v41 = vld [vmem:[%s3730_s29 + $0x1a8] sm:$0xff]  ;;  %v2146_v62 = vld [vmem:[%s3730_s29 + $0x1a0] sm:$0xff]  ;;  %v1317_v32 = vld [vmem:[%s3730_s29 + $0x18] sm:$0xff] }
 0x166   : > { %1393 = vmatpush.msra.mxu3 %v2111_v55  ;;  %v676_v51 = vld [vmem:[%s2832_s12] sm:$0xff]  ;;  %v1710_v6 = vld [vmem:[%s3731_s30 + $0x50] sm:$0xff] }
 0x167   : > { %1586 = vmatpush.msra.mxu2 %v2153_v8  ;;  %1474 = vmatpush.msrb.mxu1 %v1327_v38  ;;  %v803_v54 = vmul.f32 %v2905_v39, %v676_v51  ;;  %v2102_v55 = vld [vmem:[%s3730_s29 + $0xc0] sm:$0xff]  ;;  %v1337_v39 = vld [vmem:[%s3730_s29 + $0xb8] sm:$0xff] }
 0x168   : > { %1394 = vmatpush.msra.mxu3 %v2110_v5  ;;  %v1325_v5 = vld [vmem:[%s3730_s29 + $0x58] sm:$0xff] }
 0x169   : > { %1587 = vmatpush.msra.mxu2 %v2152_v48  ;;  %v814_v63 = vadd.f32 %v2918_v45, %v803_v54  ;;  %1475 = vmatpush.msrb.mxu1 %v1326_v56  ;;  %v2145_v8 = vld [vmem:[%s3730_s29 + $0x198] sm:$0xff]  ;;  %v1324_v45 = vld [vmem:[%s3730_s29 + $0x50] sm:$0xff]  ;;  %v2143_v48 = vld [vmem:[%s3730_s29 + $0x188] sm:$0xff] }
 0x16a   : > { %1395 = vmatpush.msra.mxu3 %v2109_v9  ;;  %v2144_v9 = vld [vmem:[%s3730_s29 + $0x190] sm:$0xff]  ;;  %v1331_v54 = vld [vmem:[%s3730_s29 + $0x88] sm:$0xff] }
 0x16b   : > { %1588 = vmatpush.msra.mxu2 %v2151_v18  ;;  %v824_v2 = vmax.f32 %v814_v63, 0.0  ;;  %1476 = vmatpush.msrb.mxu1 %v1325_v5  ;;  %v2142_v18 = vld [vmem:[%s3730_s29 + $0x180] sm:$0xff]  ;;  %v3432_v63 = vpop.f32.mrf.mxu0 }
 0x16c   : > { %2133 = vmatmul.msk.f32.gmra.mxu0 %vm1303_vm6, %v3260_v10  ;;  %1396 = vmatpush.msra.mxu3 %v2108_v14  ;;  %v1323_v14 = vld [vmem:[%s3730_s29 + $0x48] sm:$0xff] }
 0x16d   : > { %1589 = vmatpush.msra.mxu2 %v2150_v49  ;;  %1477 = vmatpush.msrb.mxu1 %v1324_v45  ;;  %v1336_v49 = vld [vmem:[%s3730_s29 + $0xb0] sm:$0xff] }
 0x16e   : > { %1397 = vmatpush.msra.mxu3 %v2107_v15  ;;  %884 = vmatmul.f32.gmra.mxu2 %v824_v2  ;;  %v1322_v15 = vld [vmem:[%s3730_s29 + $0x40] sm:$0xff] }
 0x16f   : > { %1590 = vmatpush.msra.mxu2 %v2149_v28  ;;  %1478 = vmatpush.msrb.mxu1 %v1323_v14  ;;  %v1319_v28 = vld [vmem:[%s3730_s29 + $0x28] sm:$0xff]  ;;  %v2101_v14 = vsel %vm1180_vm3, 1.0, %v2634_v57 }
 0x170   : > { %1398 = vmatpush.msra.mxu3 %v2106_v25  ;;  %v1320_v25 = vld [vmem:[%s3730_s29 + $0x30] sm:$0xff] }
 0x171   : > { %1591 = vmatpush.msra.mxu2 %v2148_v27  ;;  %1479 = vmatpush.msrb.mxu1 %v1322_v15  ;;  %v1334_v27 = vld [vmem:[%s3730_s29 + $0xa0] sm:$0xff] }
 0x172   : > { %1399 = vmatpush.msra.mxu3 %v2105_v29  ;;  %v1318_v29 = vld [vmem:[%s3730_s29 + $0x20] sm:$0xff] }
 0x173   : > { %1592 = vmatpush.msra.mxu2 %v2147_v41  ;;  %1480 = vmatpush.msrb.mxu1 %v1321_v21  ;;  %v3436_v2 = vpop.f32.mrf.mxu0 }
 0x174   : > { %2166 = vmatmul.msk.f32.vlgmr.msra.gmra.mxu0 %vm1303_vm6, %v3066_v30  ;;  %1400 = vmatpush.msra.mxu3 %v2104_v31  ;;  %v1335_v31 = vld [vmem:[%s3730_s29 + $0xa8] sm:$0xff] }
 0x175   : > { %1593 = vmatpush.msra.mxu2 %v2146_v62  ;;  %1481 = vmatpush.msrb.mxu1 %v1320_v25  ;;  %v1330_v62 = vld [vmem:[%s3730_s29 + $0x80] sm:$0xff]  ;;  %v1706_v25 = vld [vmem:[%s3731_s30 + $0x30] sm:$0xff] }
 0x176   : > { %1401 = vmatpush.msra.mxu3 %v2103_v33 }
 0x177   : > { %1594 = vmatpush.msra.mxu2 %v2145_v8  ;;  %1482 = vmatpush.msrb.mxu1 %v1319_v28  ;;  %v1709_v28 = vld [vmem:[%s3731_s30 + $0x48] sm:$0xff] }
 0x178   : > { %1402 = vmatpush.msra.mxu3 %v2102_v55 }
 0x179   : > { %1595 = vmatpush.msra.mxu2 %v2144_v9  ;;  %1483 = vmatpush.msrb.mxu1 %v1318_v29 }
 0x17a   : > { %1521 = vmatpush.msrb.mxu3 %v1337_v39 }
 0x17b   : > { %1596 = vmatpush.msra.mxu2 %v2143_v48  ;;  %1484 = vmatpush.msrb.mxu1 %v1317_v32 }
 0x17c   : > { %2167 = vmatmul.msk.f32.gmra.mxu0 %vm1303_vm6, %v3082_v60  ;;  %1522 = vmatpush.msrb.mxu3 %v1336_v49  ;;  %v3504_v49 = vpop.f32.mrf.mxu1 }
 0x17d   : > { %1597 = vmatpush.msra.mxu2 %v2142_v18  ;;  %v1708_v18 = vld [vmem:[%s3731_s30 + $0x40] sm:$0xff] }
 0x17e   : > { %1523 = vmatpush.msrb.mxu3 %v1335_v31 }
 0x17f   : > { %2217 = vmatpush.msrb.mxu2 %v3093_v0  ;;  %v1316_v0 = vld [vmem:[%s3730_s29 + $0x10] sm:$0xff] }
 0x180   : > { %1485 = vmatpush.msrb.mxu1 %v1316_v0  ;;  %1524 = vmatpush.msrb.mxu3 %v1334_v27  ;;  %v1704_v0 = vld [vmem:[%s3731_s30 + $0x20] sm:$0xff] }
 0x181   : > { %2218 = vmatpush.msrb.mxu2 %v3098_v1  ;;  %v1315_v1 = vld [vmem:[%s3730_s29 + $0x8] sm:$0xff] }
 0x182   : > { %1486 = vmatpush.msrb.mxu1 %v1315_v1  ;;  %v1707_v1 = vld [vmem:[%s3731_s30 + $0x38] sm:$0xff] }
 0x183   : > { %2219 = vmatpush.msrb.mxu2 %v3104_v3  ;;  %v1314_v3 = vld [vmem:[%s3730_s29] sm:$0xff] }
 0x184   : > { %2168 = vmatmul.msk.f32.gmra.mxu0 %vm1303_vm6, %v3121_v16  ;;  %1487 = vmatpush.msrb.mxu1 %v1314_v3  ;;  %v3514_v31 = vpop.f32.mrf.mxu1 }
 0x185   : > { %2220 = vmatpush.msrb.mxu2 %v3113_v12 }
 0x187   : > { %2221 = vmatpush.msrb.mxu2 %v3133_v22 }
 0x189   : > { %2222 = vmatpush.msrb.mxu2 %v3138_v23  ;;  %v1333_v23 = vld [vmem:[%s3730_s29 + $0x98] sm:$0xff] }
 0x18a   : > { %1525 = vmatpush.msrb.mxu3 %v1333_v23  ;;  %v1705_v23 = vld [vmem:[%s3731_s30 + $0x28] sm:$0xff] }
 0x18b   : > { %2223 = vmatpush.msrb.mxu2 %v3144_v26 }
 0x18c   : > { %2169 = vmatmul.msk.f32.gmra.mxu0 %vm1303_vm6, %v3161_v43 }
 0x18d   : > { %2224 = vmatpush.msrb.mxu2 %v3153_v24 }
 0x194   : > { %2170 = vmatmul.msk.f32.gmra.mxu0 %vm1303_vm6, %v3187_v11 }
 0x199   : > { %v1276_v12 = vpop.permute.xlu0 %1275 }
 0x19a   : > { %v1305_v22 = vsel %vm1303_vm6, %v3033_v4, %v1276_v12  ;;  %v1332_v4 = vld [vmem:[%s3730_s29 + $0x90] sm:$0xff]  ;;  %v3526_v12 = vpop.f32.mrf.mxu1 }
 0x19b   : > { %1403 = vmatmul.f32.vlgmr.msra.gmra.mxu3 %v1305_v22 }
 0x19c   : > { %2171 = vmatmul.msk.f32.gmra.mxu0 %vm1303_vm6, %v3224_v42  ;;  %1526 = vmatpush.msrb.mxu3 %v1332_v4 }
 0x19e   : > { %1527 = vmatpush.msrb.mxu3 %v1331_v54  ;;  %v1701_v54 = vld [vmem:[%s3731_s30 + $0x8] sm:$0xff] }
 0x1a0   : > { %1528 = vmatpush.msrb.mxu3 %v1330_v62 }
 0x1a1   : > { %v1278_v26 = vpop.permute.xlu0 %1277  ;;  %v1284_v33 = vpop.permute.xlu2 %1283 }
 0x1a2   : > { %v1306_v38 = vsel %vm1303_vm6, %v3052_v20, %v1278_v26  ;;  %v2082_v20 = vsel %vm1141_vm2, 1.0, %v2634_v57  ;;  %2225 = vmatpush.msra.mxu3 %v1715_v52 }
 0x1a3   : > { %1406 = vmatmul.f32.gmra.mxu3 %v1306_v38  ;;  %1598 = vmatmul.f32.vlgmr.msra.gmra.mxu2 %v1306_v38 }
 0x1a4   : > { %2172 = vmatmul.msk.f32.gmra.mxu0 %vm1303_vm6, %v3260_v10  ;;  %v1222_v10 = vmul.f32 %v2082_v20, %v3017_v58  ;;  %v1309_v58 = vsel %vm1303_vm6, %v3123_v17, %v1284_v33  ;;  %v3440_v17 = vpop.f32.mrf.mxu0 }
 0x1a9   : > { %v1280_v24 = vpop.permute.xlu1 %1279  ;;  %v1286_v41 = vpop.permute.xlu2 %1285 }
 0x1aa   : > { %v1307_v51 = vsel %vm1303_vm6, %v3068_v36, %v1280_v24 }
 0x1ab   : > { %1409 = vmatmul.f32.gmra.mxu3 %v1307_v51  ;;  %1601 = vmatmul.f32.gmra.mxu2 %v1307_v51 }
 0x1ac   : > { %v3444_v9 = vpop.f32.mrf.mxu0 }
 0x1b1   : > { %v1282_v55 = vpop.permute.xlu1 %1281  ;;  %v1274_v56 = vpop.permute.xlu2 %1273 }
 0x1b2   : > { %v1308_v53 = vsel %vm1303_vm6, %v3084_v61, %v1282_v55  ;;  %v1304_v36 = vsel %vm1303_vm6, %v1222_v10, %v1274_v56  ;;  %v1310_v61 = vsel %vm1303_vm6, %v3163_v44, %v1286_v41  ;;  %v1700_v41 = vld [vmem:[%s3731_s30] sm:$0xff] }
 0x1b3   : > { %1412 = vmatmul.f32.gmra.mxu3 %v1308_v53  ;;  %1488 = vmatmul.f32.vlgmr.msrb.gmra.mxu1 %v1304_v36 }
 0x1b4   : > { %1604 = vmatmul.f32.gmra.mxu2 %v1308_v53  ;;  %v3456_v48 = vpop.f32.mrf.mxu0 }
 0x1bb   : > { %1415 = vmatmul.f32.gmra.mxu3 %v1309_v58  ;;  %1491 = vmatmul.f32.gmra.mxu1 %v1305_v22  ;;  %v1702_v22 = vld [vmem:[%s3731_s30 + $0x10] sm:$0xff] }
 0x1bc   : > { %1607 = vmatmul.f32.gmra.mxu2 %v1309_v58 }
 0x1c3   : > { %1418 = vmatmul.f32.gmra.mxu3 %v1310_v61  ;;  %1494 = vmatmul.f32.gmra.mxu1 %v1306_v38  ;;  %v3538_v38 = vpop.f32.mrf.mxu1 }
 0x1c4   : > { %1610 = vmatmul.f32.gmra.mxu2 %v1310_v61 }
 0x1c9   : > { %v1288_v39 = vpop.permute.xlu0 %1287 }
 0x1ca   : > { %v1311_v5 = vsel %vm1303_vm6, %v3189_v13, %v1288_v39 }
 0x1cb   : > { %1421 = vmatmul.f32.gmra.mxu3 %v1311_v5  ;;  %1497 = vmatmul.f32.gmra.mxu1 %v1307_v51  ;;  %v1703_v51 = vld [vmem:[%s3731_s30 + $0x18] sm:$0xff] }
 0x1cc   : > { %1613 = vmatmul.f32.gmra.mxu2 %v1311_v5 }
 0x1d1   : > { %v1290_v8 = vpop.permute.xlu1 %1289  ;;  %v1292_v44 = vpop.permute.xlu0 %1291 }
 0x1d2   : > { %v1312_v45 = vsel %vm1303_vm6, %v3226_v47, %v1290_v8  ;;  %v1313_v13 = vsel %vm1303_vm6, %v3228_v50, %v1292_v44  ;;  %v1262_v47 = vmul.f32 %v2101_v14, %v3022_v59 }
 0x1d3   : > { %1424 = vmatmul.f32.gmra.mxu3 %v1312_v45  ;;  %1500 = vmatmul.f32.gmra.mxu1 %v1308_v53 }
 0x1d4   : > { %1616 = vmatmul.f32.gmra.mxu2 %v1312_v45 }
 0x1db   : > { %1503 = vmatmul.f32.gmra.mxu1 %v1309_v58  ;;  %2134 = vmatmul.msk.f32.vlgmr.msrb.gmra.mxu3 %vm1303_vm6, %v3039_v7  ;;  %v3461_v7 = vpop.f32.mrf.mxu0 }
 0x1dc   : > { %1619 = vmatmul.f32.gmra.mxu2 %v1313_v13  ;;  %v3558_v13 = vld [vmem:[#allocation11] ss:$0 sm:$0xff] }
 0x1e3   : > { %1506 = vmatmul.f32.gmra.mxu1 %v1310_v61  ;;  %2135 = vmatmul.msk.f32.gmra.mxu3 %vm1303_vm6, %v3050_v19  ;;  %v3465_v57 = vpop.f32.mrf.mxu0 }
 0x1e4   : > { %2173 = vmatmul.msk.f32.vlgmr.msrb.gmra.mxu2 %vm1303_vm6, %v1262_v47 }
 0x1eb   : > { %1509 = vmatmul.f32.gmra.mxu1 %v1311_v5  ;;  %2136 = vmatmul.msk.f32.gmra.mxu3 %vm1303_vm6, %v3066_v30  ;;  %v3469_v19 = vpop.f32.mrf.mxu0  ;;  %v1714_v30 = vld [vmem:[%s3731_s30 + $0x70] sm:$0xff] }
 0x1ec   : > { %1748 = vmatpush.msra.mxu1 %v1714_v30 }
 0x1f1   : > { %v885_v59 = vpop.f32.mrf.mxu2 }
 0x1f2   : > { %v3560_v59 = vld [vmem:[#allocation11 + $0x1] ss:$0 sm:$0xff] }
 0x1f3   : > { %2137 = vmatmul.msk.f32.gmra.mxu3 %vm1303_vm6, %v3082_v60  ;;  %v3478_v60 = vpop.f32.mrf.mxu0 }
 0x1fb   : > { %2138 = vmatmul.msk.f32.gmra.mxu3 %vm1303_vm6, %v3121_v16  ;;  %v1712_v16 = vld [vmem:[%s3731_s30 + $0x60] sm:$0xff] }
 0x1fc   : > { %1749 = vmatpush.msra.mxu1 %v1712_v16 }
 0x1fe   : > { %1750 = vmatpush.msra.mxu1 %v1710_v6 }
 0x200   : > { %1751 = vmatpush.msra.mxu1 %v1708_v18 }
 0x202   : > { %1752 = vmatpush.msra.mxu1 %v1706_v25 }
 0x203   : > { %2139 = vmatmul.msk.f32.gmra.mxu3 %vm1303_vm6, %v3161_v43  ;;  %v3488_v43 = vpop.f32.mrf.mxu0 }
 0x204   : > { %1753 = vmatpush.msra.mxu1 %v1704_v0 }
 0x206   : > { %1754 = vmatpush.msra.mxu1 %v1702_v22 }
 0x208   : > { %1755 = vmatpush.msra.mxu1 %v1700_v41 }
 0x20a   : > { %1789 = vmatpush.msrb.mxu1 %v1715_v52 }
 0x20b   : > { %2140 = vmatmul.msk.f32.gmra.mxu3 %vm1303_vm6, %v3187_v11  ;;  %v1713_v11 = vld [vmem:[%s3731_s30 + $0x68] sm:$0xff]  ;;  %v3496_v15 = vpop.f32.mrf.mxu0 }
 0x20c   : > { %2226 = vmatpush.msra.mxu3 %v1713_v11  ;;  %1790 = vmatpush.msrb.mxu1 %v1713_v11 }
 0x213   : > { %2141 = vmatmul.msk.f32.gmra.mxu3 %vm1303_vm6, %v3224_v42  ;;  %v1711_v42 = vld [vmem:[%s3731_s30 + $0x58] sm:$0xff]  ;;  %v3512_v29 = vpop.f32.mrf.mxu0 }
 0x214   : > { %2227 = vmatpush.msra.mxu3 %v1711_v42  ;;  %1791 = vmatpush.msrb.mxu1 %v1711_v42 }
 0x216   : > { %2228 = vmatpush.msra.mxu3 %v1709_v28  ;;  %1792 = vmatpush.msrb.mxu1 %v1709_v28 }
 0x218   : > { %2229 = vmatpush.msra.mxu3 %v1707_v1  ;;  %1793 = vmatpush.msrb.mxu1 %v1707_v1 }
 0x21a   : > { %2230 = vmatpush.msra.mxu3 %v1705_v23  ;;  %1794 = vmatpush.msrb.mxu1 %v1705_v23 }
 0x21b   : > { %v3522_v3 = vpop.f32.mrf.mxu0 }
 0x21c   : > { %2231 = vmatpush.msra.mxu3 %v1703_v51  ;;  %1795 = vmatpush.msrb.mxu1 %v1703_v51 }
 0x21e   : > { %v1404_v50 = vpop.f32.mrf.mxu3  ;;  %2232 = vmatpush.msra.mxu3 %v1701_v54  ;;  %1796 = vmatpush.msrb.mxu1 %v1701_v54 }
 0x21f   : > { %v1446_v61 = vadd.f32 %v3469_v19, %v1404_v50 }
 0x223   : > { %v3534_v26 = vpop.f32.mrf.mxu0 }
 0x226   : > { %v1407_v21 = vpop.f32.mrf.mxu3  ;;  %v1599_v4 = vpop.f32.mrf.mxu2 }
 0x227   : > { %v1449_v16 = vadd.f32 %v3478_v60, %v1407_v21 }
 0x22b   : > { %v3548_v20 = vpop.f32.mrf.mxu0 }
 0x22e   : > { %v1410_v32 = vpop.f32.mrf.mxu3  ;;  %v1602_v55 = vpop.f32.mrf.mxu2 }
 0x22f   : > { %v1452_v60 = vadd.f32 %v3488_v43, %v1410_v32 }
 0x230   : > { %v1489_v10 = vpop.f32.mrf.mxu1 }
 0x231   : > { %v1490_v5 = vadd.f32 %v1489_v10, %v1446_v61 }
 0x233   : > { %v1640_v53 = vpop.f32.mrf.mxu0 }
 0x234   : > { %v1641_v45 = vadd.f32 %v1640_v53, %v1599_v4 }
 0x236   : > { %v3524_v27 = vpop.f32.mrf.mxu3 }
 0x237   : > { %v1605_v58 = vpop.f32.mrf.mxu2  ;;  %v1455_v53 = vadd.f32 %v3496_v15, %v3524_v27 }
 0x238   : > { %v1492_v36 = vpop.f32.mrf.mxu1 }
 0x239   : > { %v1493_v6 = vadd.f32 %v1492_v36, %v1449_v16 }
 0x23b   : > { %v1643_v39 = vpop.f32.mrf.mxu0 }
 0x23c   : > { %v1644_v18 = vadd.f32 %v1643_v39, %v1602_v55 }
 0x23e   : > { %v3536_v33 = vpop.f32.mrf.mxu3 }
 0x23f   : > { %v1608_v30 = vpop.f32.mrf.mxu2  ;;  %v1458_v15 = vadd.f32 %v3512_v29, %v3536_v33 }
 0x240   : > { %v1495_v14 = vpop.f32.mrf.mxu1 }
 0x241   : > { %v1496_v22 = vadd.f32 %v1495_v14, %v1452_v60 }
 0x243   : > { %v1646_v19 = vpop.f32.mrf.mxu0 }
 0x244   : > { %v1647_v41 = vadd.f32 %v1646_v19, %v1605_v58 }
 0x246   : > { %v3540_v24 = vpop.f32.mrf.mxu3 }
 0x247   : > { %v1611_v1 = vpop.f32.mrf.mxu2 }
 0x248   : > { %v1498_v0 = vpop.f32.mrf.mxu1 }
 0x249   : > { %v1499_v36 = vadd.f32 %v1498_v0, %v1455_v53 }
 0x24b   : > { %v1649_v10 = vpop.f32.mrf.mxu0 }
 0x24c   : > { %v1650_v58 = vadd.f32 %v1649_v10, %v1608_v30 }
 0x24e   : > { %v3553_v56 = vpop.f32.mrf.mxu3 }
 0x24f   : > { %v1614_v39 = vpop.f32.mrf.mxu2 }
 0x250   : > { %v1501_v32 = vpop.f32.mrf.mxu1 }
 0x253   : > { %v1652_v14 = vpop.f32.mrf.mxu0 }
 0x254   : > { %v1653_v19 = vadd.f32 %v1652_v14, %v1611_v1 }
 0x256   : > { %v3555_v62 = vpop.f32.mrf.mxu3 }
 0x25b   : > { %v1655_v33 = vpop.f32.mrf.mxu0 }
 0x25e   : > { %v1530_v8 = vpop.f32.mrf.mxu3 }
 0x25f   : > { %v1531_v44 = vadd.f32 %v1530_v8, %v1490_v5 }
 0x261   : > { %v1664_v47 = vadd.f32 %v1641_v45, %v1531_v44 }
 0x263   : > { %v1675_v52 = vmul.f32 %v3558_v13, %v1664_v47  ;;  %v1502_v47 = vadd.f32 %v1501_v32, %v1458_v15 }
 0x265   : > { %v3565_v11 = vadd.f32 %v3560_v59, %v1675_v52  ;;  %v1504_v52 = vpop.f32.mrf.mxu1 }
 0x266   : > { %v1533_v50 = vpop.f32.mrf.mxu3 }
 0x267   : > { %v1692_v42 = vmax.f32 %v3565_v11, 0.0  ;;  %v1534_v25 = vadd.f32 %v1533_v50, %v1493_v6 }
 0x269   : > { %v1665_v28 = vadd.f32 %v1644_v18, %v1534_v25  ;;  %2174 = vmatmul.msk.f32.vlgmr.msra.gmra.mxu1 %vm1303_vm6, %v1692_v42  ;;  %v1617_v18 = vpop.f32.mrf.mxu2 }
 0x26b   : > { %v1676_v21 = vmul.f32 %v3558_v13, %v1665_v28  ;;  %v1461_v28 = vadd.f32 %v3522_v3, %v3540_v24  ;;  %v1464_v3 = vadd.f32 %v3534_v26, %v3553_v56 }
 0x26d   : > { %v1685_v23 = vadd.f32 %v3560_v59, %v1676_v21  ;;  %v1505_v0 = vadd.f32 %v1504_v52, %v1461_v28 }
 0x26e   : > { %v1536_v4 = vpop.f32.mrf.mxu3 }
 0x26f   : > { %v1537_v51 = vadd.f32 %v1536_v4, %v1496_v22  ;;  %v1693_v54 = vmax.f32 %v1685_v23, 0.0  ;;  %v1656_v22 = vadd.f32 %v1655_v33, %v1614_v39  ;;  %v1507_v4 = vpop.f32.mrf.mxu1 }
 0x271   : > { %v1666_v55 = vadd.f32 %v1647_v41, %v1537_v51  ;;  %2175 = vmatmul.msk.f32.gmra.mxu1 %vm1303_vm6, %v1693_v54  ;;  %2183 = vmatmul.msk.f32.vlgmr.msra.gmra.mxu3 %vm1303_vm6, %v1693_v54  ;;  %v1620_v51 = vpop.f32.mrf.mxu2  ;;  %v1508_v54 = vadd.f32 %v1507_v4, %v1464_v3 }
 0x273   : > { %v1677_v43 = vmul.f32 %v3558_v13, %v1666_v55  ;;  %v1658_v55 = vpop.f32.mrf.mxu0 }
 0x275   : > { %v1686_v61 = vadd.f32 %v3560_v59, %v1677_v43  ;;  %v1659_v43 = vadd.f32 %v1658_v55, %v1617_v18 }
 0x276   : > { %v1539_v5 = vpop.f32.mrf.mxu3 }
 0x277   : > { %v1540_v8 = vadd.f32 %v1539_v5, %v1499_v36  ;;  %v1694_v45 = vmax.f32 %v1686_v61, 0.0  ;;  %v1510_v39 = vpop.f32.mrf.mxu1  ;;  %v1467_v5 = vadd.f32 %v3548_v20, %v3555_v62 }
 0x279   : > { %v1667_v44 = vadd.f32 %v1650_v58, %v1540_v8  ;;  %2176 = vmatmul.msk.f32.gmra.mxu1 %vm1303_vm6, %v1694_v45  ;;  %2184 = vmatmul.msk.f32.gmra.mxu3 %vm1303_vm6, %v1694_v45  ;;  %v1661_v56 = vpop.f32.mrf.mxu2  ;;  %v1511_v58 = vadd.f32 %v1510_v39, %v1467_v5 }
 0x27b   : > { %v1678_v27 = vmul.f32 %v3558_v13, %v1667_v44  ;;  %v1662_v44 = vadd.f32 %v1661_v56, %v1620_v51 }
 0x27d   : > { %v1687_v16 = vadd.f32 %v3560_v59, %v1678_v27 }
 0x27e   : > { %v1542_v6 = vpop.f32.mrf.mxu3 }
 0x27f   : > { %v1543_v30 = vadd.f32 %v1542_v6, %v1502_v47  ;;  %v1695_v50 = vmax.f32 %v1687_v16, 0.0  ;;  %v1822_v16 = vld [vmem:[#allocation12] sm:$0x3] }
 0x280   : > { %v1824_v52 = vperm.slane %v1822_v16, 0 }
 0x281   : > { %v1668_v25 = vadd.f32 %v1653_v19, %v1543_v30  ;;  %2177 = vmatmul.msk.f32.gmra.mxu1 %vm1303_vm6, %v1695_v50  ;;  %2185 = vmatmul.msk.f32.gmra.mxu3 %vm1303_vm6, %v1695_v50 }
 0x283   : > { %v1679_v29 = vmul.f32 %v3558_v13, %v1668_v25 }
 0x285   : > { %v1688_v60 = vadd.f32 %v3560_v59, %v1679_v29 }
 0x286   : > { %v1545_v21 = vpop.f32.mrf.mxu3 }
 0x287   : > { %v1546_v1 = vadd.f32 %v1545_v21, %v1505_v0  ;;  %v1696_v23 = vmax.f32 %v1688_v60, 0.0 }
 0x289   : > { %v1669_v41 = vadd.f32 %v1656_v22, %v1546_v1  ;;  %2178 = vmatmul.msk.f32.gmra.mxu1 %vm1303_vm6, %v1696_v23  ;;  %2186 = vmatmul.msk.f32.gmra.mxu3 %vm1303_vm6, %v1696_v23 }
 0x28b   : > { %v1680_v24 = vmul.f32 %v3558_v13, %v1669_v41 }
 0x28d   : > { %v1689_v10 = vadd.f32 %v3560_v59, %v1680_v24 }
 0x28e   : > { %v1548_v53 = vpop.f32.mrf.mxu3 }
 0x28f   : > { %v1549_v32 = vadd.f32 %v1548_v53, %v1508_v54  ;;  %v1697_v36 = vmax.f32 %v1689_v10, 0.0 }
 0x291   : > { %v1670_v61 = vadd.f32 %v1659_v43, %v1549_v32  ;;  %2179 = vmatmul.msk.f32.gmra.mxu1 %vm1303_vm6, %v1697_v36  ;;  %2187 = vmatmul.msk.f32.gmra.mxu3 %vm1303_vm6, %v1697_v36 }
 0x293   : > { %v1681_v26 = vmul.f32 %v3558_v13, %v1670_v61 }
 0x295   : > { %v1690_v8 = vadd.f32 %v3560_v59, %v1681_v26 }
 0x296   : > { %v1551_v45 = vpop.f32.mrf.mxu3 }
 0x297   : > { %v1552_v14 = vadd.f32 %v1551_v45, %v1511_v58  ;;  %v1698_v15 = vmax.f32 %v1690_v8, 0.0 }
 0x299   : > { %v1671_v27 = vadd.f32 %v1662_v44, %v1552_v14  ;;  %2180 = vmatmul.msk.f32.gmra.mxu1 %vm1303_vm6, %v1698_v15  ;;  %2188 = vmatmul.msk.f32.gmra.mxu3 %vm1303_vm6, %v1698_v15 }
 0x29b   : > { %v1682_v47 = vmul.f32 %v3558_v13, %v1671_v27 }
 0x29d   : > { %v1691_v20 = vadd.f32 %v3560_v59, %v1682_v47 }
 0x29f   : > { %v1699_v62 = vmax.f32 %v1691_v20, 0.0 }
 0x2a1   : > { %2181 = vmatmul.msk.f32.gmra.mxu1 %vm1303_vm6, %v1699_v62  ;;  %2189 = vmatmul.msk.f32.gmra.mxu3 %vm1303_vm6, %v1699_v62 }
 0x2a9   : > { %2182 = vmatmul.msk.f32.vlgmr.msrb.gmra.mxu1 %vm1303_vm6, %v1692_v42  ;;  %v1825_v42 = vperm.slane %v1822_v16, 1 }
 0x2e6   : > { %v1757_v6 = vpop.f32.mrf.mxu1 }
 0x2e7   : > { %v1758_v19 = vadd.f32 %v1757_v6, %v3422_v46 }
 0x2e9   : > { %v1828_v30 = vadd.f32 %v1824_v52, %v1758_v19 }
 0x2eb   : > { %1844 = vst [vmem:[%s3615_s6] sm:$0xff] %v1828_v30 }
 0x2ee   : > { %v1760_v13 = vpop.f32.mrf.mxu1 }
 0x2ef   : > { %v1761_v59 = vadd.f32 %v1760_v13, %v3432_v63 }
 0x2f1   : > { %v1830_v11 = vadd.f32 %v1824_v52, %v1761_v59 }
 0x2f3   : > { %1846 = vst [vmem:[%s3615_s6 + $0x10] sm:$0xff] %v1830_v11 }
 0x2f4   : > { %v1801_v50 = vpop.f32.mrf.mxu3 }
 0x2f5   : > { %v1802_v18 = vadd.f32 %v1801_v50, %v3514_v31 }
 0x2f6   : > { %v1763_v46 = vpop.f32.mrf.mxu1 }
 0x2f7   : > { %v1831_v25 = vadd.f32 %v1825_v42, %v1802_v18  ;;  %v1764_v28 = vadd.f32 %v1763_v46, %v3436_v2 }
 0x2f9   : > { %1847 = vst [vmem:[%s3615_s6 + $0x18] sm:$0xff] %v1831_v25  ;;  %v1832_v29 = vadd.f32 %v1824_v52, %v1764_v28 }
 0x2fb   : > { %1848 = vst [vmem:[%s3615_s6 + $0x20] sm:$0xff] %v1832_v29 }
 0x2fc   : > { %v1804_v33 = vpop.f32.mrf.mxu3 }
 0x2fd   : > { %v1805_v63 = vadd.f32 %v1804_v33, %v3526_v12 }
 0x2fe   : > { %v1766_v0 = vpop.f32.mrf.mxu1 }
 0x2ff   : > { %v1833_v60 = vadd.f32 %v1825_v42, %v1805_v63  ;;  %v1767_v21 = vadd.f32 %v1766_v0, %v3440_v17 }
 0x301   : > { %1849 = vst [vmem:[%s3615_s6 + $0x28] sm:$0xff] %v1833_v60  ;;  %v1834_v22 = vadd.f32 %v1824_v52, %v1767_v21 }
 0x303   : > { %1850 = vst [vmem:[%s3615_s6 + $0x30] sm:$0xff] %v1834_v22 }
 0x304   : > { %v1807_v31 = vpop.f32.mrf.mxu3 }
 0x305   : > { %v1808_v2 = vadd.f32 %v1807_v31, %v3538_v38 }
 0x306   : > { %v1769_v1 = vpop.f32.mrf.mxu1 }
 0x307   : > { %v1835_v23 = vadd.f32 %v1825_v42, %v1808_v2  ;;  %v1770_v4 = vadd.f32 %v1769_v1, %v3444_v9 }
 0x309   : > { %1851 = vst [vmem:[%s3615_s6 + $0x38] sm:$0xff] %v1835_v23  ;;  %v1836_v41 = vadd.f32 %v1824_v52, %v1770_v4 }
 0x30b   : > { %1852 = vst [vmem:[%s3615_s6 + $0x40] sm:$0xff] %v1836_v41 }
 0x30c   : > { %v1810_v12 = vpop.f32.mrf.mxu3 }
 0x30d   : > { %v1811_v17 = vadd.f32 %v1810_v12, %v2970_v34 }
 0x30e   : > { %v1772_v51 = vpop.f32.mrf.mxu1 }
 0x30f   : > { %v1837_v3 = vadd.f32 %v1825_v42, %v1811_v17  ;;  %v1773_v24 = vadd.f32 %v1772_v51, %v3456_v48 }
 0x311   : > { %1853 = vst [vmem:[%s3615_s6 + $0x48] sm:$0xff] %v1837_v3  ;;  %v1838_v54 = vadd.f32 %v1824_v52, %v1773_v24 }
 0x313   : > { %1854 = vst [vmem:[%s3615_s6 + $0x50] sm:$0xff] %v1838_v54 }
 0x314   : > { %v1813_v38 = vpop.f32.mrf.mxu3 }
 0x315   : > { %v1814_v9 = vadd.f32 %v1813_v38, %v2973_v35 }
 0x316   : > { %v1775_v10 = vpop.f32.mrf.mxu1 }
 0x317   : > { %v1839_v55 = vadd.f32 %v1825_v42, %v1814_v9  ;;  %v1776_v53 = vadd.f32 %v1775_v10, %v3461_v7 }
 0x319   : > { %1855 = vst [vmem:[%s3615_s6 + $0x58] sm:$0xff] %v1839_v55  ;;  %v1840_v34 = vadd.f32 %v1824_v52, %v1776_v53 }
 0x31b   : > { %1856 = vst [vmem:[%s3615_s6 + $0x60] sm:$0xff] %v1840_v34 }
 0x31c   : > { %v1816_v43 = vpop.f32.mrf.mxu3 }
 0x31d   : > { %v1817_v48 = vadd.f32 %v1816_v43, %v2982_v37 }
 0x31e   : > { %v1778_v32 = vpop.f32.mrf.mxu1 }
 0x31f   : > { %v1841_v36 = vadd.f32 %v1825_v42, %v1817_v48  ;;  %v1779_v61 = vadd.f32 %v1778_v32, %v3465_v57 }
 0x321   : > { %1857 = vst [vmem:[%s3615_s6 + $0x68] sm:$0xff] %v1841_v36  ;;  %v1842_v35 = vadd.f32 %v1824_v52, %v1779_v61 }
 0x323   : > { %1858 = vst [vmem:[%s3615_s6 + $0x70] sm:$0xff] %v1842_v35 }
 0x324   : > { %v1819_v7 = vpop.f32.mrf.mxu3 }
 0x325   : > { %v1820_v39 = vadd.f32 %v1819_v7, %v2997_v40 }
 0x326   : > { %v1798_v37 = vpop.f32.mrf.mxu1 }
 0x327   : > { %v1843_v5 = vadd.f32 %v1825_v42, %v1820_v39  ;;  %v1799_v57 = vadd.f32 %v1798_v37, %v3504_v49 }
 0x329   : > { %1859 = vst [vmem:[%s3615_s6 + $0x78] sm:$0xff] %v1843_v5  ;;  %v1829_v26 = vadd.f32 %v1825_v42, %v1799_v57 }
 0x32b   : > { %1845 = vst [vmem:[%s3615_s6 + $0x8] sm:$0xff] %v1829_v26 }
 0x32c   : > { %2558 = shalt.err (!%p2555_p13)
}
 0x32d   : > { %s2636_s5 = smov 256   ;;  %s2637_s17 = smov 16  }
 0x32e   : > { %2255 = dma.vmem_to_hbm [thread:$0]  (%p2755_p9), %s1877_s13, 2048, %s1879_s26, %s1861_s20, %s2636_s5, %s2636_s5, %s2637_s17  }
 0x32f PF: > { %s3734_s1 = sld [smem:[#allocation20_spill]]  ;;  %p2274_p0 = pnand %p2064_p3, %p2762_p11 }
 0x331   : > { %p2275_p1 = pneg %p2274_p0 }
 0x335   : > { %s1893_s7 = sand.u32 1, %s3734_s1  }
 0x336   : > { %s1894_s11 = scalar_lea.sflag [#allocation5], %s1893_s7 }
 0x337   : > { %2600 = dma.done.wait (%p2275_p1), %s1894_s11, 2048  }
 0x338   : > { %2602 = vsyncadd (%p2275_p1), %s1894_s11, 4294965248  ;;  %s30_s22 = sadd.s32 1, %s2625_s22   ;;  %s3736_s28 = sld [smem:[#allocation23_spill]] }
 0x339   : > { %p27_p2 = scmp.ge.s32.totalorder %s30_s22, 4   ;;  %s3737_s24 = sld [smem:[#allocation21_spill]] }
 0x33a   : > { %s3738_s17 = smov %s2609_s18  ;;  %s3739_s18 = smov %s2613_s19 }
 0x33b   : > { %s3741_s20 = smov %s2621_s21  ;;  %29 = sbr.rel (!%p27_p2) target bundleno = 17 (0x11), region = 180 }
 0x33e   : > { %s3740_s19 = smov %s3736_s28 }
 0x33f   : > { %s3742_s21 = smov %s3737_s24 }
 0x340   :  { %1900 = vsyncpa [#allocation4], 1 }
 0x341   :  { %1902 = vsyncpa [#allocation4 + $0x1], 1 }
 0x342   :  { %1903 = vsyncpa [#allocation7], 1 }
 0x343   :  { %1904 = vsyncpa [#allocation10], 1 }
 0x344   :  { %1905 = vsyncpa [#allocation13], 1 }
 0x345   :  { %1906 = vsyncpa [#allocation5], 1 }
 0x346   :  { %1908 = vsyncpa [#allocation5 + $0x1], 1 }

</bundles_post_ra>
